<compile_context>
chip_gen: v7x
topology: tpu7x:2x2x1
jax: 0.10.0
libtpu: 0.0.40
codegen_flags: <defaults>
</compile_context>

<pallas_src>
import functools

import jax
import jax.numpy as jnp
import numpy as np
from jax.experimental import pallas as pl
from jax.experimental.pallas import tpu as pltpu

BN_EPS = 1e-5


def bn_scale_shift(p):
    """Inference-mode BN folded into scale/shift (shared by kernel wrapper and ref)."""
    scale = p["gamma"] * jax.lax.rsqrt(p["var"] + BN_EPS)
    shift = p["beta"] - p["mean"] * scale
    return scale, shift


def _dense_stack_kernel(x_ref, scale_ref, shift_ref, w_ref, b_ref, mask_ref,
                        o_ref, patch_ref, *, k, pad_lo, H, W, C0, growth, unit):
    # x_ref:     (1, C0, H*W)            raw input channels (flattened spatial)
    # scale_ref: (unit, Cin_max, 1)      per-unit BN scale   (zero-padded rows unused)
    # shift_ref: (unit, Cin_max, 1)      per-unit BN shift
    # w_ref:     (unit, growth, K_max)   bf16, row = tap*Cin_u + c, zero-padded to K_max
    # b_ref:     (unit, growth, 1)       conv bias
    # mask_ref:  (k*k, H*W)              per-tap border-validity masks (host-built)
    # o_ref:     (1, C_total, H*W)       output = [x, out_0, ..., out_{unit-1}]
    # patch_ref: VMEM (K_max, H*W) f32   im2col patch scratch
    HW = H * W

    # Raw input channels go straight into the output/stack buffer.
    o_ref[0, 0:C0, :] = x_ref[0]

    # Hoist the (tiny) per-tap mask loads; identical for every unit.
    masks = [mask_ref[t:t + 1, :] for t in range(k * k)]

    for u in range(unit):                      # static unroll over dense units
        cin = C0 + u * growth
        k_u = k * k * cin

        # BN (inference) + ReLU on the current stack prefix, lane-dense (cin, HW).
        scale = scale_ref[u, 0:cin, :]         # (cin, 1)
        shift = shift_ref[u, 0:cin, :]         # (cin, 1)
        a = jnp.maximum(o_ref[0, 0:cin, :] * scale + shift, 0.0)

        # im2col via lane rolls + border masks (zero padding applied AFTER BN+ReLU,
        # exactly like ConstantPad after the preactivation in the PyTorch module).
        for dy in range(k):
            for dx in range(k):
                t = dy * k + dx
                oy = dy - pad_lo
                ox = dx - pad_lo
                s = (-(oy * W + ox)) % HW
                rolled = a if s == 0 else pltpu.roll(a, s, 1)
                if oy == 0 and ox == 0:
                    tap = rolled               # center tap: mask is all ones
                else:
                    tap = rolled * masks[t]
                patch_ref[t * cin:(t + 1) * cin, :] = tap

        # Single MXU matmul: (growth, K_u) @ (K_u, HW), bf16 operands, f32 accumulate.
        w_u = w_ref[u, :, 0:k_u]                                   # bf16
        acc = jnp.dot(w_u, patch_ref[0:k_u, :].astype(jnp.bfloat16),
                      preferred_element_type=jnp.float32)
        out = acc + b_ref[u]                                       # (growth, HW)
        o_ref[0, C0 + u * growth:C0 + (u + 1) * growth, :] = out.astype(o_ref.dtype)


def dense_feature_stack_forward(x_nchw, params, k):
    """Forward of DenseFeatureStackWithLocalBlock.  x_nchw: (N, C, H, W) like PyTorch."""
    N, C0, H, W = x_nchw.shape
    unit = len(params)
    growth = params[0]["w"].shape[-1]
    HW = H * W
    cin_max = C0 + (unit - 1) * growth
    k_max = k * k * cin_max
    c_total = C0 + unit * growth
    pad = k - 1
    # ConstantPad rule from the PyTorch module (k=3 -> symmetric pad 1).
    pad_lo = (pad % 2) if (pad % 2 != 0) else (pad // 2)

    # ---- Host-side packing (numpy: no per-call chain of tiny XLA dispatches) ----
    scales = np.zeros((unit, cin_max, 1), np.float32)
    shifts = np.zeros((unit, cin_max, 1), np.float32)
    wmats = np.zeros((unit, growth, k_max), np.float32)
    biases = np.zeros((unit, growth, 1), np.float32)
    for u, p in enumerate(params):
        cin = C0 + u * growth
        sc, sh = bn_scale_shift(p)
        scales[u, :cin, 0] = np.asarray(sc)
        shifts[u, :cin, 0] = np.asarray(sh)
        # HWIO -> (O, H, W, I) -> (O, k*k*cin); row index = (dy*k+dx)*cin + c
        wm = np.transpose(np.asarray(p["w"]), (3, 0, 1, 2)).reshape(growth, k * k * cin)
        wmats[u, :, :k * k * cin] = wm
        biases[u, :, 0] = np.asarray(p["b"])

    # Per-tap border-validity masks (identical for every unit / sample).
    masks_np = np.zeros((k * k, HW), np.float32)
    ys, xs = np.divmod(np.arange(HW), W)
    for dy in range(k):
        for dx in range(k):
            oy, ox = dy - pad_lo, dx - pad_lo
            valid = ((ys + oy >= 0) & (ys + oy < H) &
                     (xs + ox >= 0) & (xs + ox < W))
            masks_np[dy * k + dx] = valid.astype(np.float32)

    scales = jnp.asarray(scales)
    shifts = jnp.asarray(shifts)
    wmats = jnp.asarray(wmats, dtype=jnp.bfloat16)
    biases = jnp.asarray(biases)
    masks = jnp.asarray(masks_np)

    x_flat = x_nchw.reshape(N, C0, HW)

    flops = 2 * N * HW * sum(growth * k * k * (C0 + u * growth) for u in range(unit))
    bytes_accessed = 4 * (N * C0 * HW + N * c_total * HW
                          + scales.size + shifts.size + biases.size + masks.size) \
                     + 2 * wmats.size

    kernel = functools.partial(_dense_stack_kernel, k=k, pad_lo=pad_lo, H=H, W=W,
                               C0=C0, growth=growth, unit=unit)
    out = pl.pallas_call(
        kernel,
        out_shape=jax.ShapeDtypeStruct((N, c_total, HW), jnp.float32),
        grid_spec=pltpu.PrefetchScalarGridSpec(
            num_scalar_prefetch=0,
            grid=(N,),
            in_specs=[
                pl.BlockSpec((1, C0, HW), lambda n: (n, 0, 0)),
                pl.BlockSpec((unit, cin_max, 1), lambda n: (0, 0, 0)),
                pl.BlockSpec((unit, cin_max, 1), lambda n: (0, 0, 0)),
                pl.BlockSpec((unit, growth, k_max), lambda n: (0, 0, 0)),
                pl.BlockSpec((unit, growth, 1), lambda n: (0, 0, 0)),
                pl.BlockSpec((k * k, HW), lambda n: (0, 0)),
            ],
            out_specs=pl.BlockSpec((1, c_total, HW), lambda n: (n, 0, 0)),
            scratch_shapes=[pltpu.VMEM((k_max, HW), jnp.float32)],
        ),
        compiler_params=pltpu.CompilerParams(dimension_semantics=("parallel",)),
        cost_estimate=pl.CostEstimate(flops=flops, transcendentals=0,
                                      bytes_accessed=bytes_accessed),
    )(x_flat, scales, shifts, wmats, biases, masks)
    return out.reshape(N, c_total, H, W)


def init_params(key, in_channel, kernel_size, unit, growth_rate):
    params = []
    cin = in_channel
    for _ in range(unit):
        key, kw, kb, kg, kbe, km, kv = jax.random.split(key, 7)
        params.append({
            "w": 0.1 * jax.random.normal(
                kw, (kernel_size, kernel_size, cin, growth_rate), jnp.float32),
            "b": 0.05 * jax.random.normal(kb, (growth_rate,), jnp.float32),
            "gamma": 1.0 + 0.1 * jax.random.normal(kg, (cin,), jnp.float32),
            "beta": 0.1 * jax.random.normal(kbe, (cin,), jnp.float32),
            "mean": 0.1 * jax.random.normal(km, (cin,), jnp.float32),
            "var": 1.0 + 0.1 * jnp.abs(jax.random.normal(kv, (cin,), jnp.float32)),
        })
        cin += growth_rate
    return params


def reference_forward(x_nchw, params, k):
    """Pure-JAX reference (lax.conv, NCHW).  Uses the same bf16 operands / f32
    accumulation as the kernel so only summation-order differences remain."""
    # TODO(synk): BatchNorm training-mode (batch statistics + running-stat update)
    # is not implemented; both kernel and reference use inference-mode BN.
    pad = k - 1
    pad_lo = (pad % 2) if (pad % 2 != 0) else (pad // 2)
    pad_hi = pad - pad_lo
    stack = None
    for p in params:
        inp = x_nchw if stack is None else jnp.concatenate([x_nchw, stack], axis=1)
        sc, sh = bn_scale_shift(p)
        a = jnp.maximum(inp * sc[None, :, None, None] + sh[None, :, None, None], 0.0)
        a = jnp.pad(a, ((0, 0), (0, 0), (pad_lo, pad_hi), (pad_lo, pad_hi)))
        out = jax.lax.conv_general_dilated(
            a.astype(jnp.bfloat16), p["w"].astype(jnp.bfloat16),
            window_strides=(1, 1), padding="VALID",
            dimension_numbers=("NCHW", "HWIO", "NCHW"),
            preferred_element_type=jnp.float32) + p["b"][None, :, None, None]
        stack = out if stack is None else jnp.concatenate([stack, out], axis=1)
    return jnp.concatenate([x_nchw, stack], axis=1)


if __name__ == "__main__":
    # small shapes: batch=2, in_channel=4, spatial=16x16, kernel=3, 3 units, growth=4
    N, C, H, W = 2, 4, 16, 16
    KSIZE, UNIT, GROWTH = 3, 3, 4

    key = jax.random.PRNGKey(0)
    key, kx = jax.random.split(key)
    x = jax.random.normal(kx, (N, C, H, W), jnp.float32)   # NCHW, PyTorch-style

    params = init_params(key, C, KSIZE, UNIT, GROWTH)

    out = jax.block_until_ready(dense_feature_stack_forward(x, params, KSIZE))
    assert out.shape == (N, C + UNIT * GROWTH, H, W), out.shape

    ref = jax.block_until_ready(reference_forward(x, params, KSIZE))
    if not np.allclose(np.asarray(out), np.asarray(ref), rtol=1e-2, atol=1e-2):
        raise AssertionError(
            f"mismatch, max abs diff = "
            f"{np.max(np.abs(np.asarray(out) - np.asarray(ref)))}")
    print("KERNEL_OK")
</pallas_src>

<mosaic_0001>
module attributes {stable_mosaic.version = 11 : i64} {
  func.func @_dense_stack_kernel(%arg0: i32, %arg1: memref<1x4x256xf32, #tpu.memory_space<vmem>>, %arg2: memref<3x12x1xf32, #tpu.memory_space<vmem>>, %arg3: memref<3x12x1xf32, #tpu.memory_space<vmem>>, %arg4: memref<3x4x108xbf16, #tpu.memory_space<vmem>>, %arg5: memref<3x4x1xf32, #tpu.memory_space<vmem>>, %arg6: memref<9x256xf32, #tpu.memory_space<vmem>>, %arg7: memref<1x16x256xf32, #tpu.memory_space<vmem>>, %arg8: memref<108x256xf32, #tpu.memory_space<vmem>>) attributes {dimension_semantics = [#tpu.dimension_semantics<parallel>], iteration_bounds = array<i64: 2>, scalar_prefetch = 0 : i64, scratch_operands = 1 : i64, tpu.core_type = #tpu.core_type<tc>, window_params = [{transform_indices = @transform_0, window_bounds = array<i64: 1, 4, 256>}, {pipeline_mode = #tpu.pipeline_mode<synchronous>, transform_indices = @transform_1, window_bounds = array<i64: 3, 12, 1>}, {pipeline_mode = #tpu.pipeline_mode<synchronous>, transform_indices = @transform_2, window_bounds = array<i64: 3, 12, 1>}, {pipeline_mode = #tpu.pipeline_mode<synchronous>, transform_indices = @transform_3, window_bounds = array<i64: 3, 4, 108>}, {pipeline_mode = #tpu.pipeline_mode<synchronous>, transform_indices = @transform_4, window_bounds = array<i64: 3, 4, 1>}, {pipeline_mode = #tpu.pipeline_mode<synchronous>, transform_indices = @transform_5, window_bounds = array<i64: 9, 256>}, {transform_indices = @transform_6, window_bounds = array<i64: 1, 16, 256>}]} {
    %c0 = arith.constant 0 : index
    %c0_0 = arith.constant 0 : index
    %c0_1 = arith.constant 0 : index
    %0 = vector.load %arg1[%c0, %c0_0, %c0_1] : memref<1x4x256xf32, #tpu.memory_space<vmem>>, vector<1x4x256xf32>
    %1 = vector.shape_cast %0 : vector<1x4x256xf32> to vector<4x256xf32>
    %c0_2 = arith.constant 0 : index
    %c0_3 = arith.constant 0 : index
    %c0_4 = arith.constant 0 : index
    %2 = vector.load %arg7[%c0_2, %c0_3, %c0_4] : memref<1x16x256xf32, #tpu.memory_space<vmem>>, vector<1x4x256xf32>
    %3 = vector.shape_cast %2 : vector<1x4x256xf32> to vector<4x256xf32>
    %4 = vector.shape_cast %1 : vector<4x256xf32> to vector<1x4x256xf32>
    tpu.vector_store %arg7[%c0_2, %c0_3, %c0_4], %4 {strides = array<i32>} : memref<1x16x256xf32, #tpu.memory_space<vmem>>, vector<1x4x256xf32>,
    %c0_5 = arith.constant 0 : index
    %c0_6 = arith.constant 0 : index
    %5 = vector.load %arg6[%c0_5, %c0_6] : memref<9x256xf32, #tpu.memory_space<vmem>>, vector<1x256xf32>
    %c1 = arith.constant 1 : index
    %c0_7 = arith.constant 0 : index
    %6 = vector.load %arg6[%c1, %c0_7] : memref<9x256xf32, #tpu.memory_space<vmem>>, vector<1x256xf32>
    %c2 = arith.constant 2 : index
    %c0_8 = arith.constant 0 : index
    %7 = vector.load %arg6[%c2, %c0_8] : memref<9x256xf32, #tpu.memory_space<vmem>>, vector<1x256xf32>
    %c3 = arith.constant 3 : index
    %c0_9 = arith.constant 0 : index
    %8 = vector.load %arg6[%c3, %c0_9] : memref<9x256xf32, #tpu.memory_space<vmem>>, vector<1x256xf32>
    %c5 = arith.constant 5 : index
    %c0_10 = arith.constant 0 : index
    %9 = vector.load %arg6[%c5, %c0_10] : memref<9x256xf32, #tpu.memory_space<vmem>>, vector<1x256xf32>
    %c6 = arith.constant 6 : index
    %c0_11 = arith.constant 0 : index
    %10 = vector.load %arg6[%c6, %c0_11] : memref<9x256xf32, #tpu.memory_space<vmem>>, vector<1x256xf32>
    %c7 = arith.constant 7 : index
    %c0_12 = arith.constant 0 : index
    %11 = vector.load %arg6[%c7, %c0_12] : memref<9x256xf32, #tpu.memory_space<vmem>>, vector<1x256xf32>
    %c8 = arith.constant 8 : index
    %c0_13 = arith.constant 0 : index
    %12 = vector.load %arg6[%c8, %c0_13] : memref<9x256xf32, #tpu.memory_space<vmem>>, vector<1x256xf32>
    %c0_14 = arith.constant 0 : index
    %c0_15 = arith.constant 0 : index
    %c0_16 = arith.constant 0 : index
    %13 = vector.load %arg2[%c0_14, %c0_15, %c0_16] : memref<3x12x1xf32, #tpu.memory_space<vmem>>, vector<1x4x1xf32>
    %14 = vector.shape_cast %13 : vector<1x4x1xf32> to vector<4x1xf32>
    %c0_17 = arith.constant 0 : index
    %c0_18 = arith.constant 0 : index
    %c0_19 = arith.constant 0 : index
    %15 = vector.load %arg3[%c0_17, %c0_18, %c0_19] : memref<3x12x1xf32, #tpu.memory_space<vmem>>, vector<1x4x1xf32>
    %16 = vector.shape_cast %15 : vector<1x4x1xf32> to vector<4x1xf32>
    %c0_20 = arith.constant 0 : index
    %c0_21 = arith.constant 0 : index
    %c0_22 = arith.constant 0 : index
    %17 = vector.load %arg7[%c0_20, %c0_21, %c0_22] : memref<1x16x256xf32, #tpu.memory_space<vmem>>, vector<1x4x256xf32>
    %18 = vector.shape_cast %17 : vector<1x4x256xf32> to vector<4x256xf32>
    %19 = vector.broadcast %14 : vector<4x1xf32> to vector<4x256xf32>
    %20 = arith.mulf %18, %19 : vector<4x256xf32>
    %21 = vector.broadcast %16 : vector<4x1xf32> to vector<4x256xf32>
    %22 = arith.addf %20, %21 : vector<4x256xf32>
    %cst = arith.constant 0.000000e+00 : f32
    %23 = vector.broadcast %cst : f32 to vector<4x256xf32>
    %24 = arith.maximumf %22, %23 : vector<4x256xf32>
    %c17_i32 = arith.constant 17 : i32
    %25 = tpu.dynamic_rotate %24 by %c17_i32 dim 1 : vector<4x256xf32>, i32 -> vector<4x256xf32>
    %26 = vector.broadcast %5 : vector<1x256xf32> to vector<4x256xf32>
    %27 = arith.mulf %25, %26 : vector<4x256xf32>
    %c0_23 = arith.constant 0 : index
    %c0_24 = arith.constant 0 : index
    %28 = vector.load %arg8[%c0_23, %c0_24] : memref<108x256xf32, #tpu.memory_space<vmem>>, vector<4x256xf32>
    tpu.vector_store %arg8[%c0_23, %c0_24], %27 {strides = array<i32>} : memref<108x256xf32, #tpu.memory_space<vmem>>, vector<4x256xf32>,
    %c16_i32 = arith.constant 16 : i32
    %29 = tpu.dynamic_rotate %24 by %c16_i32 dim 1 : vector<4x256xf32>, i32 -> vector<4x256xf32>
    %30 = vector.broadcast %6 : vector<1x256xf32> to vector<4x256xf32>
    %31 = arith.mulf %29, %30 : vector<4x256xf32>
    %c4 = arith.constant 4 : index
    %c0_25 = arith.constant 0 : index
    %32 = vector.load %arg8[%c4, %c0_25] : memref<108x256xf32, #tpu.memory_space<vmem>>, vector<4x256xf32>
    tpu.vector_store %arg8[%c4, %c0_25], %31 {strides = array<i32>} : memref<108x256xf32, #tpu.memory_space<vmem>>, vector<4x256xf32>,
    %c15_i32 = arith.constant 15 : i32
    %33 = tpu.dynamic_rotate %24 by %c15_i32 dim 1 : vector<4x256xf32>, i32 -> vector<4x256xf32>
    %34 = vector.broadcast %7 : vector<1x256xf32> to vector<4x256xf32>
    %35 = arith.mulf %33, %34 : vector<4x256xf32>
    %c8_26 = arith.constant 8 : index
    %c0_27 = arith.constant 0 : index
    %36 = vector.load %arg8[%c8_26, %c0_27] : memref<108x256xf32, #tpu.memory_space<vmem>>, vector<4x256xf32>
    tpu.vector_store %arg8[%c8_26, %c0_27], %35 {strides = array<i32>} : memref<108x256xf32, #tpu.memory_space<vmem>>, vector<4x256xf32>,
    %c1_i32 = arith.constant 1 : i32
    %37 = tpu.dynamic_rotate %24 by %c1_i32 dim 1 : vector<4x256xf32>, i32 -> vector<4x256xf32>
    %38 = vector.broadcast %8 : vector<1x256xf32> to vector<4x256xf32>
    %39 = arith.mulf %37, %38 : vector<4x256xf32>
    %c12 = arith.constant 12 : index
    %c0_28 = arith.constant 0 : index
    %40 = vector.load %arg8[%c12, %c0_28] : memref<108x256xf32, #tpu.memory_space<vmem>>, vector<4x256xf32>
    tpu.vector_store %arg8[%c12, %c0_28], %39 {strides = array<i32>} : memref<108x256xf32, #tpu.memory_space<vmem>>, vector<4x256xf32>,
    %c16 = arith.constant 16 : index
    %c0_29 = arith.constant 0 : index
    %41 = vector.load %arg8[%c16, %c0_29] : memref<108x256xf32, #tpu.memory_space<vmem>>, vector<4x256xf32>
    tpu.vector_store %arg8[%c16, %c0_29], %24 {strides = array<i32>} : memref<108x256xf32, #tpu.memory_space<vmem>>, vector<4x256xf32>,
    %c255_i32 = arith.constant 255 : i32
    %42 = tpu.dynamic_rotate %24 by %c255_i32 dim 1 : vector<4x256xf32>, i32 -> vector<4x256xf32>
    %43 = vector.broadcast %9 : vector<1x256xf32> to vector<4x256xf32>
    %44 = arith.mulf %42, %43 : vector<4x256xf32>
    %c20 = arith.constant 20 : index
    %c0_30 = arith.constant 0 : index
    %45 = vector.load %arg8[%c20, %c0_30] : memref<108x256xf32, #tpu.memory_space<vmem>>, vector<4x256xf32>
    tpu.vector_store %arg8[%c20, %c0_30], %44 {strides = array<i32>} : memref<108x256xf32, #tpu.memory_space<vmem>>, vector<4x256xf32>,
    %c241_i32 = arith.constant 241 : i32
    %46 = tpu.dynamic_rotate %24 by %c241_i32 dim 1 : vector<4x256xf32>, i32 -> vector<4x256xf32>
    %47 = vector.broadcast %10 : vector<1x256xf32> to vector<4x256xf32>
    %48 = arith.mulf %46, %47 : vector<4x256xf32>
    %c24 = arith.constant 24 : index
    %c0_31 = arith.constant 0 : index
    %49 = vector.load %arg8[%c24, %c0_31] : memref<108x256xf32, #tpu.memory_space<vmem>>, vector<4x256xf32>
    tpu.vector_store %arg8[%c24, %c0_31], %48 {strides = array<i32>} : memref<108x256xf32, #tpu.memory_space<vmem>>, vector<4x256xf32>,
    %c240_i32 = arith.constant 240 : i32
    %50 = tpu.dynamic_rotate %24 by %c240_i32 dim 1 : vector<4x256xf32>, i32 -> vector<4x256xf32>
    %51 = vector.broadcast %11 : vector<1x256xf32> to vector<4x256xf32>
    %52 = arith.mulf %50, %51 : vector<4x256xf32>
    %c28 = arith.constant 28 : index
    %c0_32 = arith.constant 0 : index
    %53 = vector.load %arg8[%c28, %c0_32] : memref<108x256xf32, #tpu.memory_space<vmem>>, vector<4x256xf32>
    tpu.vector_store %arg8[%c28, %c0_32], %52 {strides = array<i32>} : memref<108x256xf32, #tpu.memory_space<vmem>>, vector<4x256xf32>,
    %c239_i32 = arith.constant 239 : i32
    %54 = tpu.dynamic_rotate %24 by %c239_i32 dim 1 : vector<4x256xf32>, i32 -> vector<4x256xf32>
    %55 = vector.broadcast %12 : vector<1x256xf32> to vector<4x256xf32>
    %56 = arith.mulf %54, %55 : vector<4x256xf32>
    %c32 = arith.constant 32 : index
    %c0_33 = arith.constant 0 : index
    %57 = vector.load %arg8[%c32, %c0_33] : memref<108x256xf32, #tpu.memory_space<vmem>>, vector<4x256xf32>
    tpu.vector_store %arg8[%c32, %c0_33], %56 {strides = array<i32>} : memref<108x256xf32, #tpu.memory_space<vmem>>, vector<4x256xf32>,
    %c0_34 = arith.constant 0 : index
    %c0_35 = arith.constant 0 : index
    %c0_36 = arith.constant 0 : index
    %58 = vector.load %arg4[%c0_34, %c0_35, %c0_36] : memref<3x4x108xbf16, #tpu.memory_space<vmem>>, vector<1x4x36xbf16>
    %59 = vector.shape_cast %58 : vector<1x4x36xbf16> to vector<4x36xbf16>
    %c0_37 = arith.constant 0 : index
    %c0_38 = arith.constant 0 : index
    %60 = vector.load %arg8[%c0_37, %c0_38] : memref<108x256xf32, #tpu.memory_space<vmem>>, vector<36x256xf32>
    %61 = arith.truncf %60 : vector<36x256xf32> to vector<36x256xbf16>
    %cst_39 = arith.constant dense<0.000000e+00> : vector<4x256xf32>
    %62 = tpu.matmul %59, %61, %cst_39 {dimension_numbers = #tpu.dot_dimension_numbers<[1], [0], [0], [1], [0, 0, 1, 1], [], []>} : vector<4x36xbf16>, vector<36x256xbf16>, vector<4x256xf32> -> vector<4x256xf32>
    %c0_40 = arith.constant 0 : index
    %c0_41 = arith.constant 0 : index
    %c0_42 = arith.constant 0 : index
    %63 = vector.load %arg5[%c0_40, %c0_41, %c0_42] : memref<3x4x1xf32, #tpu.memory_space<vmem>>, vector<1x4x1xf32>
    %64 = vector.shape_cast %63 : vector<1x4x1xf32> to vector<4x1xf32>
    %65 = vector.broadcast %64 : vector<4x1xf32> to vector<4x256xf32>
    %66 = arith.addf %62, %65 : vector<4x256xf32>
    %c0_43 = arith.constant 0 : index
    %c4_44 = arith.constant 4 : index
    %c0_45 = arith.constant 0 : index
    %67 = vector.load %arg7[%c0_43, %c4_44, %c0_45] : memref<1x16x256xf32, #tpu.memory_space<vmem>>, vector<1x4x256xf32>
    %68 = vector.shape_cast %67 : vector<1x4x256xf32> to vector<4x256xf32>
    %69 = vector.shape_cast %66 : vector<4x256xf32> to vector<1x4x256xf32>
    tpu.vector_store %arg7[%c0_43, %c4_44, %c0_45], %69 {strides = array<i32>} : memref<1x16x256xf32, #tpu.memory_space<vmem>>, vector<1x4x256xf32>,
    %c1_46 = arith.constant 1 : index
    %c0_47 = arith.constant 0 : index
    %c0_48 = arith.constant 0 : index
    %70 = vector.load %arg2[%c1_46, %c0_47, %c0_48] : memref<3x12x1xf32, #tpu.memory_space<vmem>>, vector<1x8x1xf32>
    %71 = vector.shape_cast %70 : vector<1x8x1xf32> to vector<8x1xf32>
    %c1_49 = arith.constant 1 : index
    %c0_50 = arith.constant 0 : index
    %c0_51 = arith.constant 0 : index
    %72 = vector.load %arg3[%c1_49, %c0_50, %c0_51] : memref<3x12x1xf32, #tpu.memory_space<vmem>>, vector<1x8x1xf32>
    %73 = vector.shape_cast %72 : vector<1x8x1xf32> to vector<8x1xf32>
    %c0_52 = arith.constant 0 : index
    %c0_53 = arith.constant 0 : index
    %c0_54 = arith.constant 0 : index
    %74 = vector.load %arg7[%c0_52, %c0_53, %c0_54] : memref<1x16x256xf32, #tpu.memory_space<vmem>>, vector<1x8x256xf32>
    %75 = vector.shape_cast %74 : vector<1x8x256xf32> to vector<8x256xf32>
    %76 = vector.broadcast %71 : vector<8x1xf32> to vector<8x256xf32>
    %77 = arith.mulf %75, %76 : vector<8x256xf32>
    %78 = vector.broadcast %73 : vector<8x1xf32> to vector<8x256xf32>
    %79 = arith.addf %77, %78 : vector<8x256xf32>
    %cst_55 = arith.constant 0.000000e+00 : f32
    %80 = vector.broadcast %cst_55 : f32 to vector<8x256xf32>
    %81 = arith.maximumf %79, %80 : vector<8x256xf32>
    %c17_i32_56 = arith.constant 17 : i32
    %82 = tpu.dynamic_rotate %81 by %c17_i32_56 dim 1 : vector<8x256xf32>, i32 -> vector<8x256xf32>
    %83 = vector.broadcast %5 : vector<1x256xf32> to vector<8x256xf32>
    %84 = arith.mulf %82, %83 : vector<8x256xf32>
    %c0_57 = arith.constant 0 : index
    %c0_58 = arith.constant 0 : index
    %85 = vector.load %arg8[%c0_57, %c0_58] : memref<108x256xf32, #tpu.memory_space<vmem>>, vector<8x256xf32>
    tpu.vector_store %arg8[%c0_57, %c0_58], %84 {strides = array<i32>} : memref<108x256xf32, #tpu.memory_space<vmem>>, vector<8x256xf32>,
    %c16_i32_59 = arith.constant 16 : i32
    %86 = tpu.dynamic_rotate %81 by %c16_i32_59 dim 1 : vector<8x256xf32>, i32 -> vector<8x256xf32>
    %87 = vector.broadcast %6 : vector<1x256xf32> to vector<8x256xf32>
    %88 = arith.mulf %86, %87 : vector<8x256xf32>
    %c8_60 = arith.constant 8 : index
    %c0_61 = arith.constant 0 : index
    %89 = vector.load %arg8[%c8_60, %c0_61] : memref<108x256xf32, #tpu.memory_space<vmem>>, vector<8x256xf32>
    tpu.vector_store %arg8[%c8_60, %c0_61], %88 {strides = array<i32>} : memref<108x256xf32, #tpu.memory_space<vmem>>, vector<8x256xf32>,
    %c15_i32_62 = arith.constant 15 : i32
    %90 = tpu.dynamic_rotate %81 by %c15_i32_62 dim 1 : vector<8x256xf32>, i32 -> vector<8x256xf32>
    %91 = vector.broadcast %7 : vector<1x256xf32> to vector<8x256xf32>
    %92 = arith.mulf %90, %91 : vector<8x256xf32>
    %c16_63 = arith.constant 16 : index
    %c0_64 = arith.constant 0 : index
    %93 = vector.load %arg8[%c16_63, %c0_64] : memref<108x256xf32, #tpu.memory_space<vmem>>, vector<8x256xf32>
    tpu.vector_store %arg8[%c16_63, %c0_64], %92 {strides = array<i32>} : memref<108x256xf32, #tpu.memory_space<vmem>>, vector<8x256xf32>,
    %c1_i32_65 = arith.constant 1 : i32
    %94 = tpu.dynamic_rotate %81 by %c1_i32_65 dim 1 : vector<8x256xf32>, i32 -> vector<8x256xf32>
    %95 = vector.broadcast %8 : vector<1x256xf32> to vector<8x256xf32>
    %96 = arith.mulf %94, %95 : vector<8x256xf32>
    %c24_66 = arith.constant 24 : index
    %c0_67 = arith.constant 0 : index
    %97 = vector.load %arg8[%c24_66, %c0_67] : memref<108x256xf32, #tpu.memory_space<vmem>>, vector<8x256xf32>
    tpu.vector_store %arg8[%c24_66, %c0_67], %96 {strides = array<i32>} : memref<108x256xf32, #tpu.memory_space<vmem>>, vector<8x256xf32>,
    %c32_68 = arith.constant 32 : index
    %c0_69 = arith.constant 0 : index
    %98 = vector.load %arg8[%c32_68, %c0_69] : memref<108x256xf32, #tpu.memory_space<vmem>>, vector<8x256xf32>
    tpu.vector_store %arg8[%c32_68, %c0_69], %81 {strides = array<i32>} : memref<108x256xf32, #tpu.memory_space<vmem>>, vector<8x256xf32>,
    %c255_i32_70 = arith.constant 255 : i32
    %99 = tpu.dynamic_rotate %81 by %c255_i32_70 dim 1 : vector<8x256xf32>, i32 -> vector<8x256xf32>
    %100 = vector.broadcast %9 : vector<1x256xf32> to vector<8x256xf32>
    %101 = arith.mulf %99, %100 : vector<8x256xf32>
    %c40 = arith.constant 40 : index
    %c0_71 = arith.constant 0 : index
    %102 = vector.load %arg8[%c40, %c0_71] : memref<108x256xf32, #tpu.memory_space<vmem>>, vector<8x256xf32>
    tpu.vector_store %arg8[%c40, %c0_71], %101 {strides = array<i32>} : memref<108x256xf32, #tpu.memory_space<vmem>>, vector<8x256xf32>,
    %c241_i32_72 = arith.constant 241 : i32
    %103 = tpu.dynamic_rotate %81 by %c241_i32_72 dim 1 : vector<8x256xf32>, i32 -> vector<8x256xf32>
    %104 = vector.broadcast %10 : vector<1x256xf32> to vector<8x256xf32>
    %105 = arith.mulf %103, %104 : vector<8x256xf32>
    %c48 = arith.constant 48 : index
    %c0_73 = arith.constant 0 : index
    %106 = vector.load %arg8[%c48, %c0_73] : memref<108x256xf32, #tpu.memory_space<vmem>>, vector<8x256xf32>
    tpu.vector_store %arg8[%c48, %c0_73], %105 {strides = array<i32>} : memref<108x256xf32, #tpu.memory_space<vmem>>, vector<8x256xf32>,
    %c240_i32_74 = arith.constant 240 : i32
    %107 = tpu.dynamic_rotate %81 by %c240_i32_74 dim 1 : vector<8x256xf32>, i32 -> vector<8x256xf32>
    %108 = vector.broadcast %11 : vector<1x256xf32> to vector<8x256xf32>
    %109 = arith.mulf %107, %108 : vector<8x256xf32>
    %c56 = arith.constant 56 : index
    %c0_75 = arith.constant 0 : index
    %110 = vector.load %arg8[%c56, %c0_75] : memref<108x256xf32, #tpu.memory_space<vmem>>, vector<8x256xf32>
    tpu.vector_store %arg8[%c56, %c0_75], %109 {strides = array<i32>} : memref<108x256xf32, #tpu.memory_space<vmem>>, vector<8x256xf32>,
    %c239_i32_76 = arith.constant 239 : i32
    %111 = tpu.dynamic_rotate %81 by %c239_i32_76 dim 1 : vector<8x256xf32>, i32 -> vector<8x256xf32>
    %112 = vector.broadcast %12 : vector<1x256xf32> to vector<8x256xf32>
    %113 = arith.mulf %111, %112 : vector<8x256xf32>
    %c64 = arith.constant 64 : index
    %c0_77 = arith.constant 0 : index
    %114 = vector.load %arg8[%c64, %c0_77] : memref<108x256xf32, #tpu.memory_space<vmem>>, vector<8x256xf32>
    tpu.vector_store %arg8[%c64, %c0_77], %113 {strides = array<i32>} : memref<108x256xf32, #tpu.memory_space<vmem>>, vector<8x256xf32>,
    %c1_78 = arith.constant 1 : index
    %c0_79 = arith.constant 0 : index
    %c0_80 = arith.constant 0 : index
    %115 = vector.load %arg4[%c1_78, %c0_79, %c0_80] : memref<3x4x108xbf16, #tpu.memory_space<vmem>>, vector<1x4x72xbf16>
    %116 = vector.shape_cast %115 : vector<1x4x72xbf16> to vector<4x72xbf16>
    %c0_81 = arith.constant 0 : index
    %c0_82 = arith.constant 0 : index
    %117 = vector.load %arg8[%c0_81, %c0_82] : memref<108x256xf32, #tpu.memory_space<vmem>>, vector<72x256xf32>
    %118 = arith.truncf %117 : vector<72x256xf32> to vector<72x256xbf16>
    %cst_83 = arith.constant dense<0.000000e+00> : vector<4x256xf32>
    %119 = tpu.matmul %116, %118, %cst_83 {dimension_numbers = #tpu.dot_dimension_numbers<[1], [0], [0], [1], [0, 0, 1, 1], [], []>} : vector<4x72xbf16>, vector<72x256xbf16>, vector<4x256xf32> -> vector<4x256xf32>
    %c1_84 = arith.constant 1 : index
    %c0_85 = arith.constant 0 : index
    %c0_86 = arith.constant 0 : index
    %120 = vector.load %arg5[%c1_84, %c0_85, %c0_86] : memref<3x4x1xf32, #tpu.memory_space<vmem>>, vector<1x4x1xf32>
    %121 = vector.shape_cast %120 : vector<1x4x1xf32> to vector<4x1xf32>
    %122 = vector.broadcast %121 : vector<4x1xf32> to vector<4x256xf32>
    %123 = arith.addf %119, %122 : vector<4x256xf32>
    %c0_87 = arith.constant 0 : index
    %c8_88 = arith.constant 8 : index
    %c0_89 = arith.constant 0 : index
    %124 = vector.load %arg7[%c0_87, %c8_88, %c0_89] : memref<1x16x256xf32, #tpu.memory_space<vmem>>, vector<1x4x256xf32>
    %125 = vector.shape_cast %124 : vector<1x4x256xf32> to vector<4x256xf32>
    %126 = vector.shape_cast %123 : vector<4x256xf32> to vector<1x4x256xf32>
    tpu.vector_store %arg7[%c0_87, %c8_88, %c0_89], %126 {strides = array<i32>} : memref<1x16x256xf32, #tpu.memory_space<vmem>>, vector<1x4x256xf32>,
    %c2_90 = arith.constant 2 : index
    %c0_91 = arith.constant 0 : index
    %c0_92 = arith.constant 0 : index
    %127 = vector.load %arg2[%c2_90, %c0_91, %c0_92] : memref<3x12x1xf32, #tpu.memory_space<vmem>>, vector<1x12x1xf32>
    %128 = vector.shape_cast %127 : vector<1x12x1xf32> to vector<12x1xf32>
    %c2_93 = arith.constant 2 : index
    %c0_94 = arith.constant 0 : index
    %c0_95 = arith.constant 0 : index
    %129 = vector.load %arg3[%c2_93, %c0_94, %c0_95] : memref<3x12x1xf32, #tpu.memory_space<vmem>>, vector<1x12x1xf32>
    %130 = vector.shape_cast %129 : vector<1x12x1xf32> to vector<12x1xf32>
    %c0_96 = arith.constant 0 : index
    %c0_97 = arith.constant 0 : index
    %c0_98 = arith.constant 0 : index
    %131 = vector.load %arg7[%c0_96, %c0_97, %c0_98] : memref<1x16x256xf32, #tpu.memory_space<vmem>>, vector<1x12x256xf32>
    %132 = vector.shape_cast %131 : vector<1x12x256xf32> to vector<12x256xf32>
    %133 = vector.broadcast %128 : vector<12x1xf32> to vector<12x256xf32>
    %134 = arith.mulf %132, %133 : vector<12x256xf32>
    %135 = vector.broadcast %130 : vector<12x1xf32> to vector<12x256xf32>
    %136 = arith.addf %134, %135 : vector<12x256xf32>
    %cst_99 = arith.constant 0.000000e+00 : f32
    %137 = vector.broadcast %cst_99 : f32 to vector<12x256xf32>
    %138 = arith.maximumf %136, %137 : vector<12x256xf32>
    %c17_i32_100 = arith.constant 17 : i32
    %139 = tpu.dynamic_rotate %138 by %c17_i32_100 dim 1 : vector<12x256xf32>, i32 -> vector<12x256xf32>
    %140 = vector.broadcast %5 : vector<1x256xf32> to vector<12x256xf32>
    %141 = arith.mulf %139, %140 : vector<12x256xf32>
    %c0_101 = arith.constant 0 : index
    %c0_102 = arith.constant 0 : index
    %142 = vector.load %arg8[%c0_101, %c0_102] : memref<108x256xf32, #tpu.memory_space<vmem>>, vector<12x256xf32>
    tpu.vector_store %arg8[%c0_101, %c0_102], %141 {strides = array<i32>} : memref<108x256xf32, #tpu.memory_space<vmem>>, vector<12x256xf32>,
    %c16_i32_103 = arith.constant 16 : i32
    %143 = tpu.dynamic_rotate %138 by %c16_i32_103 dim 1 : vector<12x256xf32>, i32 -> vector<12x256xf32>
    %144 = vector.broadcast %6 : vector<1x256xf32> to vector<12x256xf32>
    %145 = arith.mulf %143, %144 : vector<12x256xf32>
    %c12_104 = arith.constant 12 : index
    %c0_105 = arith.constant 0 : index
    %146 = vector.load %arg8[%c12_104, %c0_105] : memref<108x256xf32, #tpu.memory_space<vmem>>, vector<12x256xf32>
    tpu.vector_store %arg8[%c12_104, %c0_105], %145 {strides = array<i32>} : memref<108x256xf32, #tpu.memory_space<vmem>>, vector<12x256xf32>,
    %c15_i32_106 = arith.constant 15 : i32
    %147 = tpu.dynamic_rotate %138 by %c15_i32_106 dim 1 : vector<12x256xf32>, i32 -> vector<12x256xf32>
    %148 = vector.broadcast %7 : vector<1x256xf32> to vector<12x256xf32>
    %149 = arith.mulf %147, %148 : vector<12x256xf32>
    %c24_107 = arith.constant 24 : index
    %c0_108 = arith.constant 0 : index
    %150 = vector.load %arg8[%c24_107, %c0_108] : memref<108x256xf32, #tpu.memory_space<vmem>>, vector<12x256xf32>
    tpu.vector_store %arg8[%c24_107, %c0_108], %149 {strides = array<i32>} : memref<108x256xf32, #tpu.memory_space<vmem>>, vector<12x256xf32>,
    %c1_i32_109 = arith.constant 1 : i32
    %151 = tpu.dynamic_rotate %138 by %c1_i32_109 dim 1 : vector<12x256xf32>, i32 -> vector<12x256xf32>
    %152 = vector.broadcast %8 : vector<1x256xf32> to vector<12x256xf32>
    %153 = arith.mulf %151, %152 : vector<12x256xf32>
    %c36 = arith.constant 36 : index
    %c0_110 = arith.constant 0 : index
    %154 = vector.load %arg8[%c36, %c0_110] : memref<108x256xf32, #tpu.memory_space<vmem>>, vector<12x256xf32>
    tpu.vector_store %arg8[%c36, %c0_110], %153 {strides = array<i32>} : memref<108x256xf32, #tpu.memory_space<vmem>>, vector<12x256xf32>,
    %c48_111 = arith.constant 48 : index
    %c0_112 = arith.constant 0 : index
    %155 = vector.load %arg8[%c48_111, %c0_112] : memref<108x256xf32, #tpu.memory_space<vmem>>, vector<12x256xf32>
    tpu.vector_store %arg8[%c48_111, %c0_112], %138 {strides = array<i32>} : memref<108x256xf32, #tpu.memory_space<vmem>>, vector<12x256xf32>,
    %c255_i32_113 = arith.constant 255 : i32
    %156 = tpu.dynamic_rotate %138 by %c255_i32_113 dim 1 : vector<12x256xf32>, i32 -> vector<12x256xf32>
    %157 = vector.broadcast %9 : vector<1x256xf32> to vector<12x256xf32>
    %158 = arith.mulf %156, %157 : vector<12x256xf32>
    %c60 = arith.constant 60 : index
    %c0_114 = arith.constant 0 : index
    %159 = vector.load %arg8[%c60, %c0_114] : memref<108x256xf32, #tpu.memory_space<vmem>>, vector<12x256xf32>
    tpu.vector_store %arg8[%c60, %c0_114], %158 {strides = array<i32>} : memref<108x256xf32, #tpu.memory_space<vmem>>, vector<12x256xf32>,
    %c241_i32_115 = arith.constant 241 : i32
    %160 = tpu.dynamic_rotate %138 by %c241_i32_115 dim 1 : vector<12x256xf32>, i32 -> vector<12x256xf32>
    %161 = vector.broadcast %10 : vector<1x256xf32> to vector<12x256xf32>
    %162 = arith.mulf %160, %161 : vector<12x256xf32>
    %c72 = arith.constant 72 : index
    %c0_116 = arith.constant 0 : index
    %163 = vector.load %arg8[%c72, %c0_116] : memref<108x256xf32, #tpu.memory_space<vmem>>, vector<12x256xf32>
    tpu.vector_store %arg8[%c72, %c0_116], %162 {strides = array<i32>} : memref<108x256xf32, #tpu.memory_space<vmem>>, vector<12x256xf32>,
    %c240_i32_117 = arith.constant 240 : i32
    %164 = tpu.dynamic_rotate %138 by %c240_i32_117 dim 1 : vector<12x256xf32>, i32 -> vector<12x256xf32>
    %165 = vector.broadcast %11 : vector<1x256xf32> to vector<12x256xf32>
    %166 = arith.mulf %164, %165 : vector<12x256xf32>
    %c84 = arith.constant 84 : index
    %c0_118 = arith.constant 0 : index
    %167 = vector.load %arg8[%c84, %c0_118] : memref<108x256xf32, #tpu.memory_space<vmem>>, vector<12x256xf32>
    tpu.vector_store %arg8[%c84, %c0_118], %166 {strides = array<i32>} : memref<108x256xf32, #tpu.memory_space<vmem>>, vector<12x256xf32>,
    %c239_i32_119 = arith.constant 239 : i32
    %168 = tpu.dynamic_rotate %138 by %c239_i32_119 dim 1 : vector<12x256xf32>, i32 -> vector<12x256xf32>
    %169 = vector.broadcast %12 : vector<1x256xf32> to vector<12x256xf32>
    %170 = arith.mulf %168, %169 : vector<12x256xf32>
    %c96 = arith.constant 96 : index
    %c0_120 = arith.constant 0 : index
    %171 = vector.load %arg8[%c96, %c0_120] : memref<108x256xf32, #tpu.memory_space<vmem>>, vector<12x256xf32>
    tpu.vector_store %arg8[%c96, %c0_120], %170 {strides = array<i32>} : memref<108x256xf32, #tpu.memory_space<vmem>>, vector<12x256xf32>,
    %c2_121 = arith.constant 2 : index
    %c0_122 = arith.constant 0 : index
    %c0_123 = arith.constant 0 : index
    %172 = vector.load %arg4[%c2_121, %c0_122, %c0_123] : memref<3x4x108xbf16, #tpu.memory_space<vmem>>, vector<1x4x108xbf16>
    %173 = vector.shape_cast %172 : vector<1x4x108xbf16> to vector<4x108xbf16>
    %c0_124 = arith.constant 0 : index
    %c0_125 = arith.constant 0 : index
    %174 = vector.load %arg8[%c0_124, %c0_125] : memref<108x256xf32, #tpu.memory_space<vmem>>, vector<108x256xf32>
    %175 = arith.truncf %174 : vector<108x256xf32> to vector<108x256xbf16>
    %cst_126 = arith.constant dense<0.000000e+00> : vector<4x256xf32>
    %176 = tpu.matmul %173, %175, %cst_126 {dimension_numbers = #tpu.dot_dimension_numbers<[1], [0], [0], [1], [0, 0, 1, 1], [], []>} : vector<4x108xbf16>, vector<108x256xbf16>, vector<4x256xf32> -> vector<4x256xf32>
    %c2_127 = arith.constant 2 : index
    %c0_128 = arith.constant 0 : index
    %c0_129 = arith.constant 0 : index
    %177 = vector.load %arg5[%c2_127, %c0_128, %c0_129] : memref<3x4x1xf32, #tpu.memory_space<vmem>>, vector<1x4x1xf32>
    %178 = vector.shape_cast %177 : vector<1x4x1xf32> to vector<4x1xf32>
    %179 = vector.broadcast %178 : vector<4x1xf32> to vector<4x256xf32>
    %180 = arith.addf %176, %179 : vector<4x256xf32>
    %c0_130 = arith.constant 0 : index
    %c12_131 = arith.constant 12 : index
    %c0_132 = arith.constant 0 : index
    %181 = vector.load %arg7[%c0_130, %c12_131, %c0_132] : memref<1x16x256xf32, #tpu.memory_space<vmem>>, vector<1x4x256xf32>
    %182 = vector.shape_cast %181 : vector<1x4x256xf32> to vector<4x256xf32>
    %183 = vector.shape_cast %180 : vector<4x256xf32> to vector<1x4x256xf32>
    tpu.vector_store %arg7[%c0_130, %c12_131, %c0_132], %183 {strides = array<i32>} : memref<1x16x256xf32, #tpu.memory_space<vmem>>, vector<1x4x256xf32>,
    return
  }
  func.func @transform_0(%arg0: i32) -> (i32, i32, i32) {
    %c0_i32 = arith.constant 0 : i32
    %c0_i32_0 = arith.constant 0 : i32
    %c0_i32_1 = arith.constant 0 : i32
    return %arg0, %c0_i32, %c0_i32_0 : i32, i32, i32
  }
  func.func @transform_1(%arg0: i32) -> (i32, i32, i32) {
    %c0_i32 = arith.constant 0 : i32
    %c0_i32_0 = arith.constant 0 : i32
    %c0_i32_1 = arith.constant 0 : i32
    %c0_i32_2 = arith.constant 0 : i32
    return %c0_i32, %c0_i32_0, %c0_i32_1 : i32, i32, i32
  }
  func.func @transform_2(%arg0: i32) -> (i32, i32, i32) {
    %c0_i32 = arith.constant 0 : i32
    %c0_i32_0 = arith.constant 0 : i32
    %c0_i32_1 = arith.constant 0 : i32
    %c0_i32_2 = arith.constant 0 : i32
    return %c0_i32, %c0_i32_0, %c0_i32_1 : i32, i32, i32
  }
  func.func @transform_3(%arg0: i32) -> (i32, i32, i32) {
    %c0_i32 = arith.constant 0 : i32
    %c0_i32_0 = arith.constant 0 : i32
    %c0_i32_1 = arith.constant 0 : i32
    %c0_i32_2 = arith.constant 0 : i32
    return %c0_i32, %c0_i32_0, %c0_i32_1 : i32, i32, i32
  }
  func.func @transform_4(%arg0: i32) -> (i32, i32, i32) {
    %c0_i32 = arith.constant 0 : i32
    %c0_i32_0 = arith.constant 0 : i32
    %c0_i32_1 = arith.constant 0 : i32
    %c0_i32_2 = arith.constant 0 : i32
    return %c0_i32, %c0_i32_0, %c0_i32_1 : i32, i32, i32
  }
  func.func @transform_5(%arg0: i32) -> (i32, i32) {
    %c0_i32 = arith.constant 0 : i32
    %c0_i32_0 = arith.constant 0 : i32
    %c0_i32_1 = arith.constant 0 : i32
    return %c0_i32, %c0_i32_0 : i32, i32
  }
  func.func @transform_6(%arg0: i32) -> (i32, i32, i32) {
    %c0_i32 = arith.constant 0 : i32
    %c0_i32_0 = arith.constant 0 : i32
    %c0_i32_1 = arith.constant 0 : i32
    return %arg0, %c0_i32, %c0_i32_0 : i32, i32, i32
  }
}

</mosaic_0001>

<bundles_post_ra>
// kernel: tpu_custom_call.1
= control target key start
LH: loop header
LB: loop body
LE: loop exit
PB: predicated region body
PF: predicated region fallthrough
CT: control target
= control target key end

     0   :  { %11 = vsyncpa [#allocation4], 0  ;;  %s2104_s0 = inlined_call_operand.vmem [shape: f32[2,4,256], index: 0, kind: input, shape index: {}]   ;;  %s2105_s1 = inlined_call_operand.vmem [shape: f32[3,12,1], index: 1, kind: input, shape index: {}]   ;;  %s2106_s2 = inlined_call_operand.vmem [shape: f32[3,12,1], index: 2, kind: input, shape index: {}]   ;;  %s2107_s3 = inlined_call_operand.vmem [shape: bf16[3,4,108], index: 3, kind: input, shape index: {}]   ;;  %s2108_s4 = inlined_call_operand.vmem [shape: f32[3,4,1], index: 4, kind: input, shape index: {}]   ;;  %s2109_s5 = inlined_call_operand.vmem [shape: f32[9,256], index: 5, kind: input, shape index: {}]   ;;  %s2110_s6 = inlined_call_operand.hbm [shape: f32[2,16,256], index: 6, kind: output, shape index: {}]  }
   0x1   :  { %13 = vsyncpa [#allocation4 + $0x1], 0  ;;  %s1422_s21 = smov 0   ;;  %s1424_s22 = smov 0  }
   0x2   :  { %s1426_s23 = smov 0   ;;  %s1428_s24 = smov 0  }
   0x3 LB: > { %s1443_s25 = sadd.s32 4294967295, %s1374_s24   ;;  %s1223_s26 = sadd.s32 4294967294, %s1374_s24   ;;  %s1374_s24 = sphi %s1428_s24, %s2130_s24   ;;  %s1370_s23 = sphi %s1426_s23, %s2129_s23   ;;  %s1366_s22 = sphi %s1424_s22, %s2128_s22   ;;  %s1362_s21 = sphi %s1422_s21, %s2127_s21  }
   0x4   : > { %s1447_s27 = sadd.s32 1, %s1374_s24   ;;  %s157_s28 = sadd.s32 1, %s1370_s23 }
   0x5   : > { %s154_s29 = ssub.s32 %s1374_s24, %s1447_s27  ;;  %p167_p0 = scmp.ne.s32.totalorder %s1370_s23, %s1366_s22 }
   0x6   : > { %p155_p1 = scmp.eq.s32.totalorder %s154_s29, 0  ;;  %p168_p2 = scmp.eq.s32.totalorder %s1443_s25, 1 }
   0x7   : > { %p173_p3 = scmp.ne.s32.totalorder %s1366_s22, %s1362_s21  ;;  %p174_p4 = scmp.eq.s32.totalorder %s1223_s26, 1 }
   0x8   : > { %s1458_s30 = scalar_select %p155_p1, %s1370_s23, %s157_s28  }
   0x9   : > { %p1460_p5 = por %p168_p2, %p167_p0  ;;  %p1464_p6 = por %p174_p4, %p173_p3 }
   0xa   : > { %p1226_p7 = scmp.ge.s32.totalorder %s1374_s24, 1  ;;  %p215_p8 = scmp.lt.s32.totalorder %s1374_s24, 3 }
   0xc   : > { %p216_p9 = pnand %p1226_p7, %p215_p8 }
   0xd   : > { %v272_v0 = vld [vmem:[%s2105_s1] sm:$0xf] (!%p216_p9)  ;;  %s2111_s11 = sand.u32 (!%p216_p9), 1, %s1366_s22   ;;  %v1376_v1 = vmov (!%p216_p9), 0   ;;  %p245_p10 = scmp.lt.s32.totalorder (!%p216_p9), %s1443_s25, 1  ;;  %v1240_v16 = vld [vmem:[%s2106_s2 + $0x10] sm:$0xff] (!%p216_p9)  ;;  %v296_v18 = vlaneseq (!%p216_p9) }
   0xe   : > { %219 = sbr.rel (%p216_p9) target bundleno = 1334 (0x536), region = 44  ;;  %1309 = vset.pattern.permute.xlu0 (!%p216_p9), %v1376_v1  ;;  %562 = vmatprep.mubr.bf16.mxu1 (!%p216_p9), %v1376_v1  ;;  %s1227_s12 = sshll.u32 (!%p216_p9), %s2111_s11, 5  ;;  %v273_v2 = vld [vmem:[%s2106_s2] sm:$0xf] (!%p216_p9)  ;;  %v1239_v17 = vld [vmem:[%s2105_s1 + $0x10] sm:$0xff] (!%p216_p9)  ;;  %vm523_vm8 = vcmask (!%p216_p9), 1041408  }
   0xf   : > { %278 = vperm.xlu0 (!%p216_p9), %1309, %v272_v0   ;;  %1310 = vset.pattern.permute.xlu1 (!%p216_p9), %v1376_v1  ;;  %s1488_s20 = scalar_lea.vmem (!%p216_p9), [#allocation3], %s1227_s12  ;;  %s2118_s26 = smov (!%p216_p9), 1   ;;  %v513_v15 = vld [vmem:[%s2108_s4] sm:$0xf] (!%p216_p9)  ;;  %v303_v19 = vshrl.u32 (!%p216_p9), %v296_v18, 7  ;;  %v1519_v20 = vand.u32 (!%p216_p9), 127, %v296_v18 }
  0x10   : > { %1130 = vmatprep.mubr.bf16.mxu0 (!%p216_p9), %v1376_v1  ;;  %s1378_s28 = smov (!%p216_p9), 16   ;;  %s1379_s29 = smov (!%p216_p9), 17   ;;  %v1230_v23 = vld [vmem:[%s2109_s5 + $0x1] ss:$8 sm:$0x3] (!%p216_p9)  ;;  %vm519_vm9 = vcmask (!%p216_p9), 293888  }
  0x11   : > { %s1380_s9 = smov (!%p216_p9), 15   ;;  %s1381_s10 = smov (!%p216_p9), 127   ;;  %v1521_v21 = vsub.s32 (!%p216_p9), 0, %v303_v19  ;;  %v1523_v22 = vsub.s32 (!%p216_p9), 1, %v303_v19  ;;  %vm320_vm0 = vcmp.lt.s32.totalorder (!%p216_p9), %v1519_v20, 16  ;;  %vm370_vm1 = vcmp.lt.s32.totalorder (!%p216_p9), %v1519_v20, 1 }
  0x12   : > { %s2112_s12 = smov (!%p216_p9), 112   ;;  %s2114_s13 = smov (!%p216_p9), 113   ;;  %v1232_v28 = vld [vmem:[%s2109_s5 + $0x3] ss:$8 sm:$0x3] (!%p216_p9)  ;;  %vm298_vm2 = vcmp.lt.s32.totalorder (!%p216_p9), %v1519_v20, 17 }
  0x13   : > { %285 = vperm.xlu0 (!%p216_p9), %1309, %v273_v2   ;;  %s2116_s14 = smov (!%p216_p9), 111   ;;  %v1530_v26 = vrot.slane (!%p216_p9), %v1230_v23, %v1521_v21  ;;  %v1533_v27 = vrot.slane (!%p216_p9), %v1230_v23, %v1523_v22  ;;  %v1546_v35 = vrot.slane (!%p216_p9), %v1232_v28, %v1521_v21  ;;  %v1549_v36 = vrot.slane (!%p216_p9), %v1232_v28, %v1523_v22  ;;  %v257_v37 = vld [vmem:[%s2109_s5] ss:$8 sm:$0x3] (!%p216_p9)  ;;  %s1161_s18 = sshll.u32 (!%p216_p9), %s1488_s20, 4  ;;  %s2056_s18 = int_to_ptr.vmem [resolvable:$true] %s1161_s18 }
  0x14   : > { %v1562_v46 = vrot.slane (!%p216_p9), %v257_v37, %v1521_v21  ;;  %v1565_v47 = vrot.slane (!%p216_p9), %v257_v37, %v1523_v22  ;;  %v1231_v48 = vld [vmem:[%s2109_s5 + $0x2] ss:$8 sm:$0x3] (!%p216_p9)  ;;  %vm348_vm3 = vcmp.lt.s32.totalorder (!%p216_p9), %v1519_v20, 15  ;;  %vm400_vm4 = vcmp.lt.s32.totalorder (!%p216_p9), %v1519_v20, 127 }
  0x15   : > { %s246_s15 = scalar_select %p245_p10, %s1443_s25, 1  ;;  %v1578_v57 = vrot.slane %v1231_v48, %v1521_v21  ;;  %v1581_v58 = vrot.slane %v1231_v48, %v1523_v22  ;;  %v1233_v59 = vld [vmem:[%s2109_s5 + $0x5] ss:$8 sm:$0x3]  ;;  %vm450_vm5 = vcmp.lt.s32.totalorder %v1519_v20, 112  ;;  %vm428_vm6 = vcmp.lt.s32.totalorder %v1519_v20, 113 }
  0x16   : > { %v1594_v2 = vrot.slane %v1233_v59, %v1521_v21  ;;  %vm478_vm7 = vcmp.lt.s32.totalorder %v1519_v20, 111  ;;  %vm724_vm10 = vcmask 1043456   ;;  %vm720_vm11 = vcmask 588800  }
  0x17   : > { %s1258_s16 = sshll.u32 %s246_s15, 3  ;;  %s2124_s15 = smov 112   ;;  %vm1091_vm12 = vcmask 1045504   ;;  %vm1087_vm13 = vcmask 883712  }
  0x18   : > { %s249_s19 = scalar_lea.vmem %s2104_s0, %s1258_s16  ;;  %s2125_s16 = smov 111  }
  0x19   : > { %v251_v3 = vld [vmem:[%s249_s19] sm:$0xff] }
  0x1a   : > { %v253_v4 = vcombine.high %v251_v3, %v251_v3  ;;  %255 = vst [vmem:[%s1488_s20] sm:$0xf] %v251_v3  ;;  %v1597_v3 = vrot.slane %v1233_v59, %v1523_v22 }
  0x1c   : > { %256 = vst [vmem:[%s1488_s20 + $0x8] sm:$0xf] %v253_v4  ;;  %v1235_v4 = vld [vmem:[%s2109_s5 + $0x7] ss:$8 sm:$0x3] }
  0x21   : > { %v274_v6 = vld [vmem:[%s1488_s20] sm:$0xf] }
  0x23   : > { %v275_v7 = vld [vmem:[%s1488_s20 + $0x8] sm:$0xf] }
  0x8e   : > { %v279_v5 = vpop.permute.xlu0 %278 }
  0x8f   : > { %v281_v8 = vmul.f32 %v279_v5, %v274_v6  ;;  %v282_v9 = vmul.f32 %v279_v5, %v275_v7 }
  0x92   : > { %v286_v10 = vpop.permute.xlu0 %285 }
  0x93   : > { %v288_v11 = vadd.f32 %v286_v10, %v281_v8  ;;  %v289_v12 = vadd.f32 %v286_v10, %v282_v9 }
  0x95   : > { %v290_v13 = vmax.f32 %v288_v11, 0.0  ;;  %v291_v14 = vmax.f32 %v289_v12, 0.0  ;;  %v1610_v11 = vrot.slane %v1235_v4, %v1521_v21  ;;  %v1613_v12 = vrot.slane %v1235_v4, %v1523_v22 }
  0x97   : > { %394 = vst [vmem:[#allocation2 + $0x20] sm:$0xf] %v290_v13  ;;  %395 = vst [vmem:[#allocation2 + $0x28] sm:$0xf] %v291_v14  ;;  %366 = vrot.lane.b32.xlu0 %v290_v13, %s2118_s26  ;;  %316 = vrot.lane.b32.xlu1 %v290_v13, %s1378_s28 }
  0x9b   : > { %292 = vrot.lane.b32.xlu0 %v290_v13, %s1379_s29  ;;  %318 = vrot.lane.b32.xlu1 %v291_v14, %s1378_s28 }
  0x9f   : > { %344 = vrot.lane.b32.xlu0 %v290_v13, %s1380_s9  ;;  %368 = vrot.lane.b32.xlu1 %v291_v14, %s2118_s26 }
  0xa3   : > { %396 = vrot.lane.b32.xlu0 %v290_v13, %s1381_s10  ;;  %294 = vrot.lane.b32.xlu1 %v291_v14, %s1379_s29 }
  0xa7   : > { %446 = vrot.lane.b32.xlu0 %v290_v13, %s2112_s12  ;;  %346 = vrot.lane.b32.xlu1 %v291_v14, %s1380_s9 }
  0xab   : > { %424 = vrot.lane.b32.xlu0 %v290_v13, %s2114_s13  ;;  %398 = vrot.lane.b32.xlu1 %v291_v14, %s1381_s10 }
  0xaf   : > { %474 = vrot.lane.b32.xlu0 %v290_v13, %s2116_s14  ;;  %448 = vrot.lane.b32.xlu1 %v291_v14, %s2112_s12  ;;  %v1234_v13 = vld [vmem:[%s2109_s5 + $0x6] ss:$8 sm:$0x3] }
  0xb0   : > { %v1629_v28 = vrot.slane %v1234_v13, %v1523_v22 }
  0xb3   : > { %516 = vperm.xlu0 %1309, %v513_v15   ;;  %426 = vrot.lane.b32.xlu1 %v291_v14, %s2114_s13 }
  0xb7   : > { %594 = vperm.xlu0 %1309, %v1240_v16   ;;  %476 = vrot.lane.b32.xlu1 %v291_v14, %s2116_s14 }
  0xbb   : > { %587 = vperm.xlu1 %1310, %v1239_v17  }
 0x109   : > { %v367_v24 = vpop.permute.xlu0 %366  ;;  %v317_v25 = vpop.permute.xlu1 %316 }
 0x10d   : > { %v293_v29 = vpop.permute.xlu0 %292  ;;  %v319_v30 = vpop.permute.xlu1 %318 }
 0x10e   : > { %v321_v31 = vsel %vm320_vm0, %v317_v25, %v319_v30  ;;  %v322_v32 = vsel %vm320_vm0, %v319_v30, %v317_v25  ;;  %v1626_v25 = vrot.slane %v1234_v13, %v1521_v21  ;;  %v1236_v30 = vld [vmem:[%s2109_s5 + $0x10] ss:$8 sm:$0x3] }
 0x10f   : > { %v334_v33 = vmul.f32 %v1530_v26, %v322_v32  ;;  %v335_v34 = vmul.f32 %v1533_v27, %v321_v31  ;;  %v1645_v48 = vrot.slane %v1236_v30, %v1523_v22 }
 0x111   : > { %v338_v38 = vrot.slane %v334_v33, 4  ;;  %v339_v39 = vrot.slane %v335_v34, 4  ;;  %v345_v40 = vpop.permute.xlu0 %344  ;;  %v369_v41 = vpop.permute.xlu1 %368 }
 0x112   : > { %v371_v42 = vsel %vm370_vm1, %v367_v24, %v369_v41  ;;  %v372_v43 = vsel %vm370_vm1, %v369_v41, %v367_v24 }
 0x113   : > { %342 = vst [vmem:[#allocation2] sm:$0xf0] %v338_v38  ;;  %343 = vst [vmem:[#allocation2 + $0x8] sm:$0xf0] %v339_v39  ;;  %v384_v44 = vmul.f32 %v1546_v35, %v372_v43  ;;  %v385_v45 = vmul.f32 %v1549_v36, %v371_v42 }
 0x115   : > { %v388_v49 = vrot.slane %v384_v44, 4  ;;  %v389_v50 = vrot.slane %v385_v45, 4  ;;  %v295_v51 = vpop.permute.xlu1 %294  ;;  %v397_v54 = vpop.permute.xlu0 %396  ;;  %v1642_v45 = vrot.slane %v1236_v30, %v1521_v21 }
 0x116   : > { %v299_v52 = vsel %vm298_vm2, %v293_v29, %v295_v51  ;;  %v300_v53 = vsel %vm298_vm2, %v295_v51, %v293_v29 }
 0x117   : > { %392 = vst [vmem:[#allocation2 + $0x10] sm:$0xf0] %v388_v49  ;;  %393 = vst [vmem:[#allocation2 + $0x18] sm:$0xf0] %v389_v50  ;;  %v312_v55 = vmul.f32 %v1562_v46, %v300_v53  ;;  %v313_v56 = vmul.f32 %v1565_v47, %v299_v52 }
 0x119   : > { %314 = vst [vmem:[#allocation2] sm:$0xf] %v312_v55  ;;  %315 = vst [vmem:[#allocation2 + $0x8] sm:$0xf] %v313_v56  ;;  %v347_v60 = vpop.permute.xlu1 %346  ;;  %v447_v5 = vpop.permute.xlu0 %446 }
 0x11a   : > { %v349_v61 = vsel %vm348_vm3, %v345_v40, %v347_v60  ;;  %v350_v62 = vsel %vm348_vm3, %v347_v60, %v345_v40 }
 0x11b   : > { %v362_v63 = vmul.f32 %v1578_v57, %v350_v62  ;;  %v363_v0 = vmul.f32 %v1581_v58, %v349_v61 }
 0x11d   : > { %364 = vst [vmem:[#allocation2 + $0x10] sm:$0xf] %v362_v63  ;;  %365 = vst [vmem:[#allocation2 + $0x18] sm:$0xf] %v363_v0  ;;  %v399_v6 = vpop.permute.xlu1 %398  ;;  %v425_v19 = vpop.permute.xlu0 %424 }
 0x11e   : > { %v401_v7 = vsel %vm400_vm4, %v397_v54, %v399_v6  ;;  %v402_v8 = vsel %vm400_vm4, %v399_v6, %v397_v54 }
 0x11f   : > { %v414_v9 = vmul.f32 %v1594_v2, %v401_v7  ;;  %v415_v10 = vmul.f32 %v1597_v3, %v402_v8 }
 0x120   : > { %v498_v29 = vld [vmem:[#allocation2 + $0x8] sm:$0xff]  ;;  %v497_v32 = vld [vmem:[#allocation2] sm:$0xff] }
 0x121   : > { %v418_v14 = vrot.slane %v414_v9, 4  ;;  %v419_v15 = vrot.slane %v415_v10, 4  ;;  %v449_v16 = vpop.permute.xlu1 %448  ;;  %v475_v49 = vpop.permute.xlu0 %474 }
 0x122   : > { %v451_v17 = vsel %vm450_vm5, %v447_v5, %v449_v16  ;;  %v452_v18 = vsel %vm450_vm5, %v449_v16, %v447_v5  ;;  %v496_v5 = vld [vmem:[%s2107_s3] sm:$0x3] }
 0x123   : > { %422 = vst [vmem:[#allocation2 + $0x20] sm:$0xf0] %v418_v14  ;;  %423 = vst [vmem:[#allocation2 + $0x28] sm:$0xf0] %v419_v15  ;;  %v464_v23 = vmul.f32 %v1610_v11, %v451_v17  ;;  %v465_v24 = vmul.f32 %v1613_v12, %v452_v18 }
 0x124   : > { %v500_v31 = vld [vmem:[#allocation2 + $0x18] sm:$0xff]  ;;  %v499_v33 = vld [vmem:[#allocation2 + $0x10] sm:$0xff] }
 0x125   : > { %v468_v34 = vrot.slane %v464_v23, 4  ;;  %v469_v37 = vrot.slane %v465_v24, 4  ;;  %v427_v38 = vpop.permute.xlu1 %426  ;;  %v508_v39 = vpack.c.bf16 %v500_v31, %v498_v29  ;;  %v507_v40 = vpack.c.bf16 %v499_v33, %v497_v32  ;;  %v1242_v33 = vld [vmem:[%s2108_s4 + $0x4] sm:$0xf] }
 0x126   : > { %v429_v41 = vsel %vm428_vm6, %v425_v19, %v427_v38  ;;  %v430_v42 = vsel %vm428_vm6, %v427_v38, %v425_v19  ;;  %v1247_v38 = vld [vmem:[%s2106_s2 + $0x20] sm:$0xff] }
 0x127   : > { %472 = vst [vmem:[#allocation2 + $0x30] sm:$0xf0] %v468_v34  ;;  %473 = vst [vmem:[#allocation2 + $0x38] sm:$0xf0] %v469_v37  ;;  %v442_v43 = vmul.f32 %v1626_v25, %v429_v41  ;;  %v443_v44 = vmul.f32 %v1629_v28, %v430_v42  ;;  %530 = vmatprep.subr.bf16.mxu1 %v508_v39  ;;  %v1245_v34 = vld [vmem:[%s2105_s1 + $0x20] sm:$0xff] }
 0x128   : > { %531 = vmatpush1.bf16.msra.mxu1 %v507_v40  ;;  %v1246_v37 = vld [vmem:[%s2105_s1 + $0x28] sm:$0xf] }
 0x129   : > { %444 = vst [vmem:[#allocation2 + $0x30] sm:$0xf] %v442_v43  ;;  %445 = vst [vmem:[#allocation2 + $0x38] sm:$0xf] %v443_v44  ;;  %v477_v50 = vpop.permute.xlu1 %476  ;;  %v1248_v39 = vld [vmem:[%s2106_s2 + $0x28] sm:$0xf] }
 0x12a   : > { %v479_v51 = vsel %vm478_vm7, %v475_v49, %v477_v50  ;;  %v480_v52 = vsel %vm478_vm7, %v477_v50, %v475_v49  ;;  %v502_v21 = vld [vmem:[#allocation2 + $0x28] sm:$0xff]  ;;  %v501_v55 = vld [vmem:[#allocation2 + $0x20] sm:$0xff] }
 0x12b   : > { %v492_v53 = vmul.f32 %v1642_v45, %v479_v51  ;;  %v493_v54 = vmul.f32 %v1645_v48, %v480_v52 }
 0x12d   : > { %494 = vst [vmem:[#allocation2 + $0x40] sm:$0xf] %v492_v53  ;;  %495 = vst [vmem:[#allocation2 + $0x48] sm:$0xf] %v493_v54 }
 0x130   : > { %v504_v22 = vld [vmem:[#allocation2 + $0x38] sm:$0xff]  ;;  %v503_v56 = vld [vmem:[#allocation2 + $0x30] sm:$0xff] }
 0x131   : > { %v510_v59 = vpack.c.bf16 %v504_v22, %v502_v21  ;;  %v509_v60 = vpack.c.bf16 %v503_v56, %v501_v55 }
 0x132   : > { %v517_v6 = vpop.permute.xlu0 %516 }
 0x133   : > { %532 = vmatprep.subr.bf16.mxu1 %v510_v59 }
 0x134   : > { %533 = vmatpush1.bf16.msra.mxu1 %v509_v60  ;;  %v506_v61 = vld [vmem:[#allocation2 + $0x48] sm:$0xf]  ;;  %v505_v62 = vld [vmem:[#allocation2 + $0x40] sm:$0xf] }
 0x135   : > { %v512_v63 = vpack.c.bf16 %v506_v61, %v506_v61  ;;  %v511_v0 = vpack.c.bf16 %v505_v62, %v505_v62 }
 0x136   : > { %v595_v24 = vpop.permute.xlu0 %594 }
 0x137   : > { %1237 = vmatprep.subr.msk.bf16.mxu1 %vm523_vm8, %v512_v63  ;;  %v525_v4 = vsel %vm523_vm8, %v511_v0, 0 }
 0x138   : > { %535 = vmatpush1.bf16.msra.mxu1 %v525_v4 }
 0x13a   : > { %v588_v17 = vpop.permute.xlu1 %587 }
 0x13b   : > { %1238 = vmatmul.mubr.msk.bf16.vlgmr.msra.gmra.mrb[0].mxu1 %vm519_vm9, %v496_v5 }
 0x13c   : > { %763 = vmatprep.mubr.bf16.mxu1 %v1376_v1 }
 0x20e   : > { %v564_v7 = vpop.f32.mrb[0].mxu1 }
 0x20f   : > { %v565_v8 = vadd.f32 %v564_v7, %v517_v6  ;;  %v566_v9 = vpop.f32.mrb[1].mxu1 }
 0x210   : > { %v567_v10 = vadd.f32 %v566_v9, %v517_v6  ;;  %v568_v13 = vpop.f32.mrb[2].mxu1 }
 0x211   : > { %v573_v14 = vrot.slane %v565_v8, 4  ;;  %v569_v15 = vpop.f32.mrb[3].mxu1 }
 0x212   : > { %v574_v16 = vrot.slane %v567_v10, 4 }
 0x213   : > { %577 = vst [vmem:[%s1488_s20] sm:$0xf0] %v573_v14 }
 0x214   : > { %578 = vst [vmem:[%s1488_s20 + $0x8] sm:$0xf0] %v574_v16 }
 0x21a   : > { %v1660_v18 = vld [vmem:[%s1488_s20] sm:$0xff] }
 0x21b   : > { %v1663_v19 = vld [vmem:[%s1488_s20 + $0x8] sm:$0xff]  ;;  %v590_v23 = vmul.f32 %v588_v17, %v1660_v18 }
 0x21c   : > { %v591_v1 = vmul.f32 %v588_v17, %v1663_v19 }
 0x21d   : > { %v597_v29 = vadd.f32 %v595_v24, %v590_v23 }
 0x21e   : > { %v598_v30 = vadd.f32 %v595_v24, %v591_v1 }
 0x21f   : > { %v1667_v31 = vmax.f32 %v597_v29, 0.0 }
 0x220   : > { %v1669_v32 = vmax.f32 %v598_v30, 0.0 }
 0x221   : > { %641 = vst [vmem:[#allocation2 + $0x40] sm:$0xff] %v1667_v31  ;;  %601 = vrot.lane.b32.xlu1 %v1667_v31, %s1379_s29 }
 0x222   : > { %642 = vst [vmem:[#allocation2 + $0x48] sm:$0xff] %v1669_v32  ;;  %603 = vrot.lane.b32.xlu0 %v1669_v32, %s1379_s29 }
 0x225   : > { %611 = vrot.lane.b32.xlu1 %v1667_v31, %s1378_s28 }
 0x226   : > { %613 = vrot.lane.b32.xlu0 %v1669_v32, %s1378_s28 }
 0x229   : > { %621 = vrot.lane.b32.xlu1 %v1667_v31, %s1380_s9 }
 0x22a   : > { %623 = vrot.lane.b32.xlu0 %v1669_v32, %s1380_s9 }
 0x22d   : > { %631 = vrot.lane.b32.xlu1 %v1667_v31, %s2118_s26 }
 0x22e   : > { %633 = vrot.lane.b32.xlu0 %v1669_v32, %s2118_s26 }
 0x231   : > { %643 = vrot.lane.b32.xlu1 %v1667_v31, %s1381_s10 }
 0x232   : > { %645 = vrot.lane.b32.xlu0 %v1669_v32, %s1381_s10 }
 0x235   : > { %653 = vrot.lane.b32.xlu1 %v1667_v31, %s2114_s13 }
 0x236   : > { %655 = vrot.lane.b32.xlu0 %v1669_v32, %s2114_s13  ;;  %s2122_s13 = smov 1  }
 0x239   : > { %663 = vrot.lane.b32.xlu1 %v1667_v31, %s2112_s12 }
 0x23a   : > { %665 = vrot.lane.b32.xlu0 %v1669_v32, %s2112_s12 }
 0x23d   : > { %673 = vrot.lane.b32.xlu1 %v1667_v31, %s2116_s14 }
 0x23e   : > { %675 = vrot.lane.b32.xlu0 %v1669_v32, %s2116_s14  ;;  %s2123_s14 = smov 113  }
 0x241   : > { %717 = vperm.xlu1 %1310, %v1242_v33  }
 0x242   : > { %786 = vperm.xlu0 %1309, %v1245_v34  }
 0x245   : > { %791 = vperm.xlu1 %1310, %v1246_v37  }
 0x246   : > { %800 = vperm.xlu0 %1309, %v1247_v38  }
 0x249   : > { %805 = vperm.xlu1 %1310, %v1248_v39  }
 0x293   : > { %v602_v40 = vpop.permute.xlu1 %601 }
 0x294   : > { %v604_v41 = vpop.permute.xlu0 %603 }
 0x295   : > { %v605_v42 = vsel %vm298_vm2, %v602_v40, %v604_v41  ;;  %v606_v43 = vsel %vm298_vm2, %v604_v41, %v602_v40 }
 0x296   : > { %v607_v52 = vmul.f32 %v606_v43, %v1562_v46  ;;  %v608_v53 = vmul.f32 %v605_v42, %v1565_v47 }
 0x297   : > { %v612_v44 = vpop.permute.xlu1 %611 }
 0x298   : > { %v614_v49 = vpop.permute.xlu0 %613 }
 0x299   : > { %v615_v50 = vsel %vm320_vm0, %v612_v44, %v614_v49  ;;  %v616_v51 = vsel %vm320_vm0, %v614_v49, %v612_v44 }
 0x29a   : > { %v617_v54 = vmul.f32 %v616_v51, %v1530_v26  ;;  %v618_v21 = vmul.f32 %v615_v50, %v1533_v27 }
 0x29b   : > { %v622_v22 = vpop.permute.xlu1 %621 }
 0x29c   : > { %619 = vst [vmem:[#allocation2 + $0x10] sm:$0xff] %v617_v54  ;;  %620 = vst [vmem:[#allocation2 + $0x18] sm:$0xff] %v618_v21  ;;  %v624_v55 = vpop.permute.xlu0 %623  ;;  %v704_v56 = vpack.c.bf16 %v618_v21, %v608_v53  ;;  %v703_v59 = vpack.c.bf16 %v617_v54, %v607_v52 }
 0x29d   : > { %v625_v60 = vsel %vm348_vm3, %v622_v22, %v624_v55  ;;  %v626_v61 = vsel %vm348_vm3, %v624_v55, %v622_v22 }
 0x29e   : > { %731 = vmatprep.subr.bf16.mxu1 %v704_v56  ;;  %v627_v5 = vmul.f32 %v626_v61, %v1578_v57  ;;  %v628_v6 = vmul.f32 %v625_v60, %v1581_v58  ;;  %v1241_v56 = vld [vmem:[%s2107_s3 + $0x2] sm:$0x3] }
 0x29f   : > { %v632_v62 = vpop.permute.xlu1 %631  ;;  %732 = vmatpush1.bf16.msra.mxu1 %v703_v59 }
 0x2a0   : > { %v634_v63 = vpop.permute.xlu0 %633 }
 0x2a1   : > { %v635_v0 = vsel %vm370_vm1, %v632_v62, %v634_v63  ;;  %v636_v4 = vsel %vm370_vm1, %v634_v63, %v632_v62 }
 0x2a2   : > { %v637_v7 = vmul.f32 %v636_v4, %v1546_v35  ;;  %v638_v8 = vmul.f32 %v635_v0, %v1549_v36 }
 0x2a3   : > { %v644_v9 = vpop.permute.xlu1 %643 }
 0x2a4   : > { %v646_v10 = vpop.permute.xlu0 %645  ;;  %v706_v13 = vpack.c.bf16 %v638_v8, %v628_v6  ;;  %v705_v14 = vpack.c.bf16 %v637_v7, %v627_v5 }
 0x2a5   : > { %v647_v15 = vsel %vm400_vm4, %v644_v9, %v646_v10  ;;  %v648_v16 = vsel %vm400_vm4, %v646_v10, %v644_v9 }
 0x2a6   : > { %v649_v17 = vmul.f32 %v647_v15, %v1594_v2  ;;  %v650_v23 = vmul.f32 %v648_v16, %v1597_v3  ;;  %733 = vmatprep.subr.bf16.mxu1 %v706_v13 }
 0x2a7   : > { %v654_v24 = vpop.permute.xlu1 %653  ;;  %734 = vmatpush1.bf16.msra.mxu1 %v705_v14 }
 0x2a8   : > { %v656_v1 = vpop.permute.xlu0 %655  ;;  %v708_v29 = vpack.c.bf16 %v650_v23, %v1669_v32  ;;  %v707_v30 = vpack.c.bf16 %v649_v17, %v1667_v31 }
 0x2a9   : > { %v657_v33 = vsel %vm428_vm6, %v654_v24, %v656_v1  ;;  %v658_v34 = vsel %vm428_vm6, %v656_v1, %v654_v24 }
 0x2aa   : > { %735 = vmatprep.subr.bf16.mxu1 %v708_v29  ;;  %v659_v32 = vmul.f32 %v657_v33, %v1626_v25  ;;  %v660_v31 = vmul.f32 %v658_v34, %v1629_v28 }
 0x2ab   : > { %v664_v37 = vpop.permute.xlu1 %663  ;;  %736 = vmatpush1.bf16.msra.mxu1 %v707_v30 }
 0x2ac   : > { %v666_v38 = vpop.permute.xlu0 %665 }
 0x2ad   : > { %v667_v39 = vsel %vm450_vm5, %v664_v37, %v666_v38  ;;  %v668_v40 = vsel %vm450_vm5, %v666_v38, %v664_v37 }
 0x2ae   : > { %v669_v41 = vmul.f32 %v667_v39, %v1610_v11  ;;  %v670_v42 = vmul.f32 %v668_v40, %v1613_v12 }
 0x2af   : > { %v674_v43 = vpop.permute.xlu1 %673 }
 0x2b0   : > { %671 = vst [vmem:[#allocation2 + $0x70] sm:$0xff] %v669_v41  ;;  %672 = vst [vmem:[#allocation2 + $0x78] sm:$0xff] %v670_v42  ;;  %v676_v44 = vpop.permute.xlu0 %675  ;;  %v710_v49 = vpack.c.bf16 %v670_v42, %v660_v31  ;;  %v709_v50 = vpack.c.bf16 %v669_v41, %v659_v32 }
 0x2b1   : > { %v677_v51 = vsel %vm478_vm7, %v674_v43, %v676_v44  ;;  %v678_v52 = vsel %vm478_vm7, %v676_v44, %v674_v43 }
 0x2b2   : > { %v679_v53 = vmul.f32 %v677_v51, %v1642_v45  ;;  %v680_v54 = vmul.f32 %v678_v52, %v1645_v48  ;;  %737 = vmatprep.subr.bf16.mxu1 %v710_v49 }
 0x2b3   : > { %738 = vmatpush1.bf16.msra.mxu1 %v709_v50 }
 0x2b4   : > { %v712_v21 = vpack.c.bf16 %v680_v54, %v680_v54  ;;  %v711_v22 = vpack.c.bf16 %v679_v53, %v679_v53 }
 0x2b6   : > { %1243 = vmatprep.subr.msk.bf16.mxu1 %vm724_vm10, %v712_v21  ;;  %v726_v55 = vsel %vm724_vm10, %v711_v22, 0 }
 0x2b7   : > { %740 = vmatpush1.bf16.msra.mxu1 %v726_v55 }
 0x2ba   : > { %1244 = vmatmul.mubr.msk.bf16.vlgmr.msra.gmra.mrb[4].mxu1 %vm720_vm11, %v1241_v56 }
 0x2c1   : > { %v787_v59 = vpop.permute.xlu0 %786 }
 0x2c2   : > { %v794_v60 = vmul.f32 %v787_v59, %v1660_v18  ;;  %v795_v61 = vmul.f32 %v787_v59, %v1663_v19  ;;  %v718_v18 = vpop.permute.xlu1 %717 }
 0x2c5   : > { %v801_v62 = vpop.permute.xlu0 %800 }
 0x2c6   : > { %v808_v63 = vadd.f32 %v801_v62, %v794_v60  ;;  %v809_v0 = vadd.f32 %v801_v62, %v795_v61  ;;  %v1807_v19 = vpop.permute.xlu1 %791 }
 0x2c8   : > { %v1777_v4 = vmax.f32 %v808_v63, 0.0  ;;  %v1779_v5 = vmax.f32 %v809_v0, 0.0 }
 0x2ca   : > { %836 = vrot.lane.b32.xlu0 %v1777_v4, %s1378_s28  ;;  %840 = vrot.lane.b32.xlu1 %v1779_v5, %s1378_s28  ;;  %v1809_v6 = vpop.permute.xlu1 %805 }
 0x2ce   : > { %816 = vrot.lane.b32.xlu0 %v1777_v4, %s1379_s29  ;;  %874 = vrot.lane.b32.xlu1 %v1779_v5, %s1380_s9 }
 0x2d2   : > { %870 = vrot.lane.b32.xlu0 %v1777_v4, %s1380_s9  ;;  %932 = vrot.lane.b32.xlu1 %v1779_v5, %s1381_s10 }
 0x2d6   : > { %890 = vrot.lane.b32.xlu0 %v1777_v4, %s2122_s13  ;;  %966 = vrot.lane.b32.xlu1 %v1779_v5, %s2123_s14 }
 0x2da   : > { %928 = vrot.lane.b32.xlu0 %v1777_v4, %s1381_s10 }
 0x2de   : > { %962 = vrot.lane.b32.xlu0 %v1777_v4, %s2123_s14 }
 0x2e2   : > { %982 = vrot.lane.b32.xlu0 %v1777_v4, %s2124_s15 }
 0x2e6   : > { %820 = vrot.lane.b32.xlu0 %v1779_v5, %s1379_s29 }
 0x2ea   : > { %894 = vrot.lane.b32.xlu0 %v1779_v5, %s2122_s13 }
 0x33c   : > { %v837_v7 = vpop.permute.xlu0 %836  ;;  %v841_v8 = vpop.permute.xlu1 %840 }
 0x33d   : > { %v844_v9 = vsel %vm320_vm0, %v837_v7, %v841_v8  ;;  %v846_v10 = vsel %vm320_vm0, %v841_v8, %v837_v7 }
 0x33e   : > { %v1816_v13 = vmul.f32 %v846_v10, %v1530_v26  ;;  %v1819_v14 = vmul.f32 %v844_v9, %v1533_v27 }
 0x340   : > { %v856_v15 = vrot.slane %v1816_v13, 4  ;;  %v857_v16 = vrot.slane %v1819_v14, 4  ;;  %v817_v17 = vpop.permute.xlu0 %816  ;;  %v875_v23 = vpop.permute.xlu1 %874 }
 0x342   : > { %866 = vst [vmem:[#allocation2 + $0x10] sm:$0xf0] %v856_v15  ;;  %867 = vst [vmem:[#allocation2 + $0x18] sm:$0xf0] %v857_v16 }
 0x344   : > { %v871_v24 = vpop.permute.xlu0 %870  ;;  %v933_v37 = vpop.permute.xlu1 %932 }
 0x345   : > { %v878_v1 = vsel %vm348_vm3, %v871_v24, %v875_v23  ;;  %v880_v29 = vsel %vm348_vm3, %v875_v23, %v871_v24 }
 0x346   : > { %v1832_v30 = vmul.f32 %v880_v29, %v1578_v57  ;;  %v1835_v33 = vmul.f32 %v878_v1, %v1581_v58 }
 0x348   : > { %886 = vst [vmem:[#allocation2 + $0x30] sm:$0xff] %v1832_v30  ;;  %887 = vst [vmem:[#allocation2 + $0x38] sm:$0xff] %v1835_v33  ;;  %v891_v34 = vpop.permute.xlu0 %890  ;;  %v967_v41 = vpop.permute.xlu1 %966 }
 0x34c   : > { %v929_v38 = vpop.permute.xlu0 %928 }
 0x34d   : > { %v936_v39 = vsel %vm400_vm4, %v929_v38, %v933_v37  ;;  %v938_v40 = vsel %vm400_vm4, %v933_v37, %v929_v38 }
 0x34e   : > { %v1844_v32 = vmul.f32 %v936_v39, %v1594_v2  ;;  %v1847_v31 = vmul.f32 %v938_v40, %v1597_v3 }
 0x350   : > { %v948_v42 = vrot.slane %v1844_v32, 4  ;;  %v949_v43 = vrot.slane %v1847_v31, 4  ;;  %v963_v44 = vpop.permute.xlu0 %962 }
 0x351   : > { %v970_v49 = vsel %vm428_vm6, %v963_v44, %v967_v41  ;;  %v972_v50 = vsel %vm428_vm6, %v967_v41, %v963_v44 }
 0x352   : > { %958 = vst [vmem:[#allocation2 + $0x70] sm:$0xf0] %v948_v42  ;;  %959 = vst [vmem:[#allocation2 + $0x78] sm:$0xf0] %v949_v43  ;;  %v1860_v51 = vmul.f32 %v970_v49, %v1626_v25  ;;  %v1863_v52 = vmul.f32 %v972_v50, %v1629_v28 }
 0x354   : > { %v983_v53 = vpop.permute.xlu0 %982 }
 0x358   : > { %v821_v54 = vpop.permute.xlu0 %820 }
 0x359   : > { %v824_v21 = vsel %vm298_vm2, %v817_v17, %v821_v54  ;;  %v826_v22 = vsel %vm298_vm2, %v821_v54, %v817_v17 }
 0x35a   : > { %v1870_v55 = vmul.f32 %v826_v22, %v1562_v46  ;;  %v1873_v56 = vmul.f32 %v824_v21, %v1565_v47 }
 0x35c   : > { %832 = vst [vmem:[#allocation2] sm:$0xff] %v1870_v55  ;;  %833 = vst [vmem:[#allocation2 + $0x8] sm:$0xff] %v1873_v56  ;;  %v895_v59 = vpop.permute.xlu0 %894 }
 0x35d   : > { %v898_v60 = vsel %vm370_vm1, %v891_v34, %v895_v59  ;;  %v900_v61 = vsel %vm370_vm1, %v895_v59, %v891_v34 }
 0x35e   : > { %v1882_v62 = vmul.f32 %v900_v61, %v1546_v35  ;;  %v1885_v63 = vmul.f32 %v898_v60, %v1549_v36 }
 0x360   : > { %v910_v0 = vrot.slane %v1882_v62, 4  ;;  %v911_v7 = vrot.slane %v1885_v63, 4 }
 0x362   : > { %920 = vst [vmem:[#allocation2 + $0x40] sm:$0xf0] %v910_v0  ;;  %921 = vst [vmem:[#allocation2 + $0x48] sm:$0xf0] %v911_v7 }
 0x38d   : > { %v765_v8 = vpop.f32.mrb[4].mxu1 }
 0x38e   : > { %v766_v9 = vadd.f32 %v765_v8, %v718_v18  ;;  %v767_v10 = vpop.f32.mrb[5].mxu1 }
 0x38f   : > { %v768_v17 = vadd.f32 %v767_v10, %v718_v18  ;;  %v769_v23 = vpop.f32.mrb[6].mxu1  ;;  %v1250_v18 = vld [vmem:[%s2108_s4 + $0x8] sm:$0xf] }
 0x390   : > { %772 = vst [vmem:[%s1488_s20 + $0x10] sm:$0xf] %v766_v9  ;;  %v770_v24 = vpop.f32.mrb[7].mxu1 }
 0x391   : > { %773 = vst [vmem:[%s1488_s20 + $0x18] sm:$0xf] %v768_v17 }
 0x397   : > { %v782_v1 = vld [vmem:[%s1488_s20 + $0x10] sm:$0xf] }
 0x398   : > { %v796_v29 = vmul.f32 %v1807_v19, %v782_v1  ;;  %v783_v34 = vld [vmem:[%s1488_s20 + $0x18] sm:$0xf] }
 0x399   : > { %v797_v37 = vmul.f32 %v1807_v19, %v783_v34 }
 0x39a   : > { %v810_v38 = vadd.f32 %v1809_v6, %v796_v29 }
 0x39b   : > { %v811_v39 = vadd.f32 %v1809_v6, %v797_v37 }
 0x39c   : > { %v814_v40 = vmax.f32 %v810_v38, 0.0 }
 0x39d   : > { %v815_v41 = vmax.f32 %v811_v39, 0.0 }
 0x39e   : > { %926 = vst [vmem:[#allocation2 + $0x70] sm:$0xf] %v814_v40  ;;  %838 = vrot.lane.b32.xlu0 %v814_v40, %s1378_s28  ;;  %818 = vrot.lane.b32.xlu1 %v814_v40, %s1379_s29 }
 0x39f   : > { %927 = vst [vmem:[#allocation2 + $0x78] sm:$0xf] %v815_v41 }
 0x3a2   : > { %986 = vrot.lane.b32.xlu0 %v1779_v5, %s2124_s15  ;;  %892 = vrot.lane.b32.xlu1 %v814_v40, %s2122_s13 }
 0x3a6   : > { %872 = vrot.lane.b32.xlu0 %v814_v40, %s1380_s9  ;;  %984 = vrot.lane.b32.xlu1 %v814_v40, %s2124_s15 }
 0x3aa   : > { %930 = vrot.lane.b32.xlu0 %v814_v40, %s1381_s10  ;;  %1018 = vrot.lane.b32.xlu1 %v814_v40, %s2125_s16 }
 0x3ae   : > { %1016 = vrot.lane.b32.xlu0 %v1777_v4, %s2125_s16  ;;  %822 = vrot.lane.b32.xlu1 %v815_v41, %s1379_s29 }
 0x3b2   : > { %964 = vrot.lane.b32.xlu0 %v814_v40, %s2123_s14  ;;  %842 = vrot.lane.b32.xlu1 %v815_v41, %s1378_s28 }
 0x3b6   : > { %1020 = vrot.lane.b32.xlu0 %v1779_v5, %s2125_s16  ;;  %896 = vrot.lane.b32.xlu1 %v815_v41, %s2122_s13 }
 0x3ba   : > { %1084 = vperm.xlu0 %1309, %v1250_v18   ;;  %876 = vrot.lane.b32.xlu1 %v815_v41, %s1380_s9 }
 0x3be   : > { %934 = vrot.lane.b32.xlu1 %v815_v41, %s1381_s10  ;;  %s1259_s10 = sshll.u32 %s1443_s25, 9  ;;  %s2126_s25 = sand.u32 1, %s1366_s22  }
 0x3bf   : > { %s2054_s12 = scalar_lea.hbm %s2110_s6, %s1259_s10  ;;  %s2062_s13 = scalar_lea.sflag [#allocation4], %s2126_s25 }
 0x3c2   : > { %988 = vrot.lane.b32.xlu1 %v815_v41, %s2124_s15  ;;  %s1385_s15 = smov [#allocation3]  }
 0x3c6   : > { %968 = vrot.lane.b32.xlu1 %v815_v41, %s2123_s14  ;;  %s1312_s14 = scalar_lea.vmem %s2056_s18, 512 }
 0x3c7   : > { %p1313_p11 = scmp.ne.s32.totalorder %s2056_s18, %s1312_s14 }
 0x3c9   : > { %p1314_p12 = pnand %p1313_p11, %p1460_p5 }
 0x3ca   : > { %1022 = vrot.lane.b32.xlu1 %v815_v41, %s2125_s16  ;;  %s1316_s16 = sshll.u32 %s1385_s15, 4  ;;  %s1317_s16 = int_to_ptr.vmem [resolvable:$false] %s1316_s16 }
 0x3cb   : > { %p1315_p13 = pneg %p1314_p12  ;;  %s1318_s11 = scalar_lea.vmem %s1317_s16, 1024 }
 0x3cc   : > { %p1319_p0 = scmp.lt.s32.totalorder %s2056_s18, %s1317_s16  ;;  %p1320_p1 = scmp.lt.s32.totalorder %s1318_s11, %s1312_s14 }
 0x3ce   : > { %p1321_p2 = por %p1320_p1, %p1319_p0 }
 0x3d0   : > { %p1322_p3 = pnand %p1321_p2, %p1315_p13 }
 0x410   : > { %v839_v19 = vpop.permute.xlu0 %838  ;;  %v819_v6 = vpop.permute.xlu1 %818 }
 0x414   : > { %v987_v44 = vpop.permute.xlu0 %986  ;;  %v893_v49 = vpop.permute.xlu1 %892 }
 0x415   : > { %v990_v50 = vsel %vm450_vm5, %v983_v53, %v987_v44  ;;  %v992_v54 = vsel %vm450_vm5, %v987_v44, %v983_v53 }
 0x416   : > { %v1931_v21 = vmul.f32 %v990_v50, %v1610_v11  ;;  %v1934_v22 = vmul.f32 %v992_v54, %v1613_v12 }
 0x418   : > { %v1002_v59 = vrot.slane %v1931_v21, 4  ;;  %v1003_v60 = vrot.slane %v1934_v22, 4  ;;  %v873_v61 = vpop.permute.xlu0 %872  ;;  %v1938_v8 = vpop.permute.xlu1 %984 }
 0x41a   : > { %1012 = vst [vmem:[#allocation2 + $0xa0] sm:$0xf0] %v1002_v59  ;;  %1013 = vst [vmem:[#allocation2 + $0xa8] sm:$0xf0] %v1003_v60 }
 0x41c   : > { %v931_v53 = vpop.permute.xlu0 %930  ;;  %v1944_v9 = vpop.permute.xlu1 %1018 }
 0x420   : > { %v1017_v10 = vpop.permute.xlu0 %1016  ;;  %v823_v17 = vpop.permute.xlu1 %822 }
 0x421   : > { %v825_v23 = vsel %vm298_vm2, %v819_v6, %v823_v17  ;;  %v827_v24 = vsel %vm298_vm2, %v823_v17, %v819_v6 }
 0x422   : > { %v830_v1 = vmul.f32 %v827_v24, %v1562_v46  ;;  %v831_v29 = vmul.f32 %v825_v23, %v1565_v47 }
 0x424   : > { %834 = vst [vmem:[#allocation2 + $0x10] sm:$0xf] %v830_v1  ;;  %835 = vst [vmem:[#allocation2 + $0x18] sm:$0xf] %v831_v29  ;;  %v1952_v34 = vpop.permute.xlu0 %964  ;;  %v843_v37 = vpop.permute.xlu1 %842 }
 0x425   : > { %v845_v38 = vsel %vm320_vm0, %v839_v19, %v843_v37  ;;  %v847_v39 = vsel %vm320_vm0, %v843_v37, %v839_v19 }
 0x426   : > { %v850_v40 = vmul.f32 %v847_v39, %v1530_v26  ;;  %v851_v41 = vmul.f32 %v845_v38, %v1533_v27 }
 0x428   : > { %v858_v18 = vrot.slane %v850_v40, 4  ;;  %v860_v6 = vrot.slane %v851_v41, 4  ;;  %v1021_v46 = vpop.permute.xlu0 %1020  ;;  %v897_v44 = vpop.permute.xlu1 %896 }
 0x429   : > { %v1024_v47 = vsel %vm478_vm7, %v1017_v10, %v1021_v46  ;;  %v1026_v50 = vsel %vm478_vm7, %v1021_v46, %v1017_v10  ;;  %v899_v54 = vsel %vm370_vm1, %v893_v49, %v897_v44  ;;  %v901_v19 = vsel %vm370_vm1, %v897_v44, %v893_v49 }
 0x42a   : > { %v859_v26 = vsel %vm724_vm10, %v856_v15, %v858_v18  ;;  %v861_v27 = vsel %vm724_vm10, %v857_v16, %v860_v6  ;;  %v1975_v17 = vmul.f32 %v1024_v47, %v1642_v45  ;;  %v1978_v23 = vmul.f32 %v1026_v50, %v1645_v48  ;;  %v1053_v6 = vld [vmem:[#allocation2 + $0x78] sm:$0xff] }
 0x42b   : > { %868 = vst [vmem:[#allocation2 + $0x20] sm:$0xff] %v859_v26  ;;  %869 = vst [vmem:[#allocation2 + $0x28] sm:$0xff] %v861_v27  ;;  %v904_v10 = vmul.f32 %v901_v19, %v1546_v35  ;;  %v905_v49 = vmul.f32 %v899_v54, %v1549_v36  ;;  %v1041_v24 = vld [vmem:[#allocation2 + $0x18] sm:$0xff]  ;;  %v1040_v13 = vld [vmem:[#allocation2 + $0x10] sm:$0xff]  ;;  %v1069_v36 = vpack.c.bf16 %v1835_v33, %v861_v27 }
 0x42c   : > { %v877_v1 = vpop.permute.xlu1 %876  ;;  %v1067_v15 = vpack.c.bf16 %v1041_v24, %v1873_v56  ;;  %v1066_v14 = vpack.c.bf16 %v1040_v13, %v1870_v55  ;;  %v1068_v33 = vpack.c.bf16 %v1832_v30, %v859_v26  ;;  %v1052_v27 = vld [vmem:[#allocation2 + $0x70] sm:$0xff] }
 0x42d   : > { %v912_v16 = vrot.slane %v904_v10, 4  ;;  %v914_v29 = vrot.slane %v905_v49, 4  ;;  %v879_v37 = vsel %vm348_vm3, %v873_v61, %v877_v1  ;;  %v881_v38 = vsel %vm348_vm3, %v877_v1, %v873_v61 }
 0x42e   : > { %v884_v39 = vmul.f32 %v881_v38, %v1578_v57  ;;  %v885_v35 = vmul.f32 %v879_v37, %v1581_v58  ;;  %1098 = vmatprep.subr.bf16.mxu0 %v1067_v15  ;;  %v1072_v22 = vpack.c.bf16 %v1052_v27, %v1777_v4 }
 0x42f   : > { %v913_v56 = vsel %vm724_vm10, %v910_v0, %v912_v16  ;;  %v915_v55 = vsel %vm724_vm10, %v911_v7, %v914_v29  ;;  %1099 = vmatpush1.bf16.msra.mxu0 %v1066_v14 }
 0x430   : > { %888 = vst [vmem:[#allocation2 + $0x40] sm:$0xf] %v884_v39  ;;  %889 = vst [vmem:[#allocation2 + $0x48] sm:$0xf] %v885_v35  ;;  %v935_v40 = vpop.permute.xlu1 %934  ;;  %1100 = vmatprep.subr.bf16.mxu0 %v1069_v36 }
 0x431   : > { %v937_v57 = vsel %vm400_vm4, %v931_v53, %v935_v40  ;;  %v939_v58 = vsel %vm400_vm4, %v935_v40, %v931_v53 }
 0x432   : > { %v942_v62 = vmul.f32 %v937_v57, %v1594_v2  ;;  %v943_v0 = vmul.f32 %v939_v58, %v1597_v3 }
 0x433   : > { %1101 = vmatpush1.bf16.msra.mxu0 %v1068_v33 }
 0x434   : > { %v950_v63 = vrot.slane %v942_v62, 4  ;;  %v952_v7 = vrot.slane %v943_v0, 4  ;;  %v989_v61 = vpop.permute.xlu1 %988 }
 0x435   : > { %v991_v41 = vsel %vm450_vm5, %v1938_v8, %v989_v61  ;;  %v993_v18 = vsel %vm450_vm5, %v989_v61, %v1938_v8 }
 0x436   : > { %v951_v30 = vsel %vm724_vm10, %v948_v42, %v950_v63  ;;  %v953_v2 = vsel %vm724_vm10, %v949_v43, %v952_v7  ;;  %v996_v3 = vmul.f32 %v991_v41, %v1610_v11  ;;  %v997_v53 = vmul.f32 %v993_v18, %v1613_v12 }
 0x437   : > { %v1047_v46 = vld [vmem:[#allocation2 + $0x48] sm:$0xff]  ;;  %v1046_v44 = vld [vmem:[#allocation2 + $0x40] sm:$0xff]  ;;  %v1073_v11 = vpack.c.bf16 %v1053_v6, %v1779_v5 }
 0x438   : > { %v1004_v47 = vrot.slane %v996_v3, 4  ;;  %v1006_v50 = vrot.slane %v997_v53, 4  ;;  %v969_v54 = vpop.permute.xlu1 %968  ;;  %v1071_v19 = vpack.c.bf16 %v915_v55, %v1047_v46  ;;  %v1070_v8 = vpack.c.bf16 %v913_v56, %v1046_v44 }
 0x439   : > { %v971_v32 = vsel %vm428_vm6, %v1952_v34, %v969_v54  ;;  %v973_v31 = vsel %vm428_vm6, %v969_v54, %v1952_v34  ;;  %v1085_v13 = vpop.permute.xlu0 %1084 }
 0x43a   : > { %v1005_v12 = vsel %vm724_vm10, %v1002_v59, %v1004_v47  ;;  %v1007_v42 = vsel %vm724_vm10, %v1003_v60, %v1006_v50  ;;  %v976_v43 = vmul.f32 %v971_v32, %v1626_v25  ;;  %v977_v26 = vmul.f32 %v973_v31, %v1629_v28  ;;  %1102 = vmatprep.subr.bf16.mxu0 %v1071_v19 }
 0x43b   : > { %1103 = vmatpush1.bf16.msra.mxu0 %v1070_v8  ;;  %v1075_v59 = vpack.c.bf16 %v1863_v52, %v953_v2  ;;  %v1074_v60 = vpack.c.bf16 %v1860_v51, %v951_v30  ;;  %v1249_v51 = vld [vmem:[%s2107_s3 + $0x4] sm:$0x3] }
 0x43c   : > { %980 = vst [vmem:[#allocation2 + $0xa0] sm:$0xf] %v976_v43  ;;  %981 = vst [vmem:[#allocation2 + $0xa8] sm:$0xf] %v977_v26  ;;  %1104 = vmatprep.subr.bf16.mxu0 %v1073_v11  ;;  %v1023_v34 = vpop.permute.xlu1 %1022 }
 0x43d   : > { %v1025_v5 = vsel %vm478_vm7, %v1944_v9, %v1023_v34  ;;  %v1027_v21 = vsel %vm478_vm7, %v1023_v34, %v1944_v9 }
 0x43e   : > { %v1030_v25 = vmul.f32 %v1025_v5, %v1642_v45  ;;  %v1031_v28 = vmul.f32 %v1027_v21, %v1645_v48 }
 0x43f   : > { %1105 = vmatpush1.bf16.msra.mxu0 %v1072_v22 }
 0x440   : > { %1034 = vst [vmem:[#allocation2 + $0xd0] sm:$0xf] %v1030_v25  ;;  %1035 = vst [vmem:[#allocation2 + $0xd8] sm:$0xf] %v1031_v28  ;;  %1106 = vmatprep.subr.bf16.mxu0 %v1075_v59 }
 0x443   : > { %1107 = vmatpush1.bf16.msra.mxu0 %v1074_v60  ;;  %v1059_v10 = vld [vmem:[#allocation2 + $0xa8] sm:$0xff]  ;;  %v1058_v49 = vld [vmem:[#allocation2 + $0xa0] sm:$0xff] }
 0x444   : > { %v1077_v24 = vpack.c.bf16 %v1007_v42, %v1059_v10  ;;  %v1076_v20 = vpack.c.bf16 %v1005_v12, %v1058_v49 }
 0x446   : > { %1108 = vmatprep.subr.bf16.mxu0 %v1077_v24 }
 0x447   : > { %1109 = vmatpush1.bf16.msra.mxu0 %v1076_v20  ;;  %v1065_v4 = vld [vmem:[#allocation2 + $0xd8] sm:$0xf]  ;;  %v1064_v45 = vld [vmem:[#allocation2 + $0xd0] sm:$0xf] }
 0x448   : > { %v1079_v48 = vpack.c.bf16 %v1065_v4, %v1978_v23  ;;  %v1078_v52 = vpack.c.bf16 %v1064_v45, %v1975_v17 }
 0x44a   : > { %1251 = vmatprep.subr.msk.bf16.mxu0 %vm1091_vm12, %v1079_v48  ;;  %v1093_v9 = vsel %vm1091_vm12, %v1078_v52, 0 }
 0x44b   : > { %1111 = vmatpush1.bf16.msra.mxu0 %v1093_v9 }
 0x44e   : > { %1252 = vmatmul.mubr.msk.bf16.vlgmr.msra.gmra.mrb[0].mxu0 %vm1087_vm13, %v1249_v51 }
 0x521   : > { %v1132_v1 = vpop.f32.mrb[0].mxu0 }
 0x522   : > { %v1133_v15 = vadd.f32 %v1132_v1, %v1085_v13  ;;  %v1134_v23 = vpop.f32.mrb[1].mxu0 }
 0x523   : > { %v1135_v17 = vadd.f32 %v1134_v23, %v1085_v13  ;;  %v1136_v14 = vpop.f32.mrb[2].mxu0 }
 0x524   : > { %v1141_v16 = vrot.slane %v1133_v15, 4  ;;  %v1137_v29 = vpop.f32.mrb[3].mxu0 }
 0x525   : > { %v1142_v37 = vrot.slane %v1135_v17, 4 }
 0x526   : > { %1145 = vst [vmem:[%s1488_s20 + $0x10] sm:$0xf0] %v1141_v16 }
 0x527   : > { %1146 = vst [vmem:[%s1488_s20 + $0x18] sm:$0xf0] %v1142_v37 }
 0x528   : > { %1325 = shalt.err (!%p1322_p3)
}
 0x529   : > { %s1326_s20 = scalar_lea.hbm %s2054_s12, 512  ;;  %s1330_s9 = scalar_lea.hbm %s2110_s6, 1024 }
 0x52a   : > { %p1327_p4 = scmp.ne.s32.totalorder %s2054_s12, %s1326_s20  ;;  %p1331_p9 = scmp.lt.u32.totalorder %s2054_s12, %s2110_s6 }
 0x52b   : > { %p1332_p10 = scmp.lt.u32.totalorder %s1330_s9, %s1326_s20  ;;  %p1334_p12 = scmp.lt.u32.totalorder %s1326_s20, %s2054_s12 }
 0x52c   : > { %p1328_p7 = pnand %p1327_p4, %p1460_p5 }
 0x52d   : > { %p1333_p11 = por %p1332_p10, %p1331_p9 }
 0x52e   : > { %p1329_p8 = pneg %p1328_p7 }
 0x52f   : > { %p1335_p13 = por %p1334_p12, %p1333_p11 }
 0x531   : > { %p1336_p0 = pnand %p1335_p13, %p1329_p8 }
 0x533   : > { %1339 = shalt.err (!%p1336_p0)
}
 0x534   : > { %s1386_s26 = smov 256  }
 0x535   : > { %1260 = dma.vmem_to_hbm [thread:$0]  (%p1460_p5), %s2056_s18, 512, %s2054_s12, %s2062_s13, %s1386_s26, %s1386_s26, %s1378_s28  }
 0x536 PF: > { %p1266_p1 = scmp.ge.s32.totalorder %s1374_s24, 2  ;;  %s1176_s25 = sand.u32 1, %s1362_s21  }
 0x537   : > { %s1177_s14 = scalar_lea.sflag [#allocation4], %s1176_s25 }
 0x538   : > { %p1263_p2 = pnand %p1266_p1, %p1464_p6 }
 0x53a   : > { %1357 = dma.done.wait (!%p1263_p2), %s1177_s14, 512  }
 0x53b   : > { %1359 = vsyncadd (!%p1263_p2), %s1177_s14, 4294966784  ;;  %p16_p3 = scmp.ge.s32.totalorder %s1447_s27, 4   ;;  %s2127_s21 = smov %s1366_s22 }
 0x53c   : > { %s2128_s22 = smov %s1370_s23  ;;  %s2129_s23 = smov %s1458_s30 }
 0x53d   : > { %s2130_s24 = smov %s1447_s27  ;;  %18 = sbr.rel (!%p16_p3) target bundleno = 3 (0x3), region = 94 }
 0x544   :  { %1182 = vsyncpa [#allocation4], 1 }
 0x545   :  { %1184 = vsyncpa [#allocation4 + $0x1], 1 }

</bundles_post_ra>
